<compile_context>
chip_gen: v7x
topology: tpu7x:2x2x1
jax: 0.10.0
libtpu: 0.0.40
codegen_flags: <defaults>
</compile_context>

<pallas_src>
import functools

import jax
import jax.numpy as jnp
from jax.experimental import pallas as pl
from jax.experimental.pallas import tpu as pltpu


# ----------------------------- Pallas kernel --------------------------------
def _convlstm_kernel(w_ref, b_ref, mask_ref, peep_ref, h_ref, x_ref, c_ref,
                     ch_ref, cc_ref, acc_ref, *, hidden, width, ksize,
                     images_per_tile):
    """One grid step = `images_per_tile` whole images (TILE_M pixels on lanes).

    Transposed layout: channels on sublanes, flattened (b, y, x) pixels on
    lanes.  Conv taps are formed in-kernel (no im2col in HBM):

      w_ref    : (k*k*4*Ch, Ch+Cin)  bf16, rows = tap-major [i;f;c;o] gates,
                                     cols = [h-channels | x-channels]
      b_ref    : (4*Ch, 1)           f32 conv biases (x-path only)
      mask_ref : (k*k, TILE_M)       bf16 {0,1} in-image masks per tap
      peep_ref : (3*Ch, H*W)         f32 [Wci; Wcf; Wco], one image's worth
      h_ref    : (Ch, TILE_M)        bf16 previous hidden state
      x_ref    : (Cin, TILE_M)       bf16 input
      c_ref    : (Ch, TILE_M)        f32 previous cell state
      ch_ref   : (Ch, TILE_M)        bf16 output hidden state
      cc_ref   : (Ch, TILE_M)        f32 output cell state
      acc_ref  : (4*Ch, TILE_M)      f32 VMEM scratch gate accumulator
    """
    tile_m = c_ref.shape[-1]
    r = (ksize - 1) // 2
    halo = r * width + r
    pad = ((halo + 127) // 128) * 128          # lane-aligned halo, >= max |shift|
    n_gate_rows = 4 * hidden

    # Raw [h ; x] channel slab (h first keeps the big 32-row block sublane
    # aligned; the 4 x-rows ride at an aligned offset behind it).
    slab = jnp.concatenate([h_ref[...], x_ref[...]], axis=0)      # (Ch+Cin, TILE_M)
    zpad = jnp.zeros((slab.shape[0], pad), dtype=slab.dtype)
    padded = jnp.concatenate([zpad, slab, zpad], axis=1)          # (Ch+Cin, TILE_M+2*pad)

    # k*k shifted + masked taps accumulated via small bf16 MXU matmuls.
    # (Kernel is memory-bound; the tiny K=Ch+Cin contraction is fine on the MXU.)
    s = 0
    for dy in range(-r, r + 1):
        for dx in range(-r, r + 1):
            off = pad + dy * width + dx                           # static offset
            shifted = padded[:, off:off + tile_m]                 # (Ch+Cin, TILE_M)
            tap = shifted * mask_ref[s:s + 1, :]                  # zero out-of-image taps
            ws = w_ref[s * n_gate_rows:(s + 1) * n_gate_rows, :]  # (4Ch, Ch+Cin)
            contrib = jnp.dot(ws, tap, preferred_element_type=jnp.float32)
            if s == 0:
                acc_ref[...] = contrib
            else:
                acc_ref[...] += contrib
            s += 1

    gates = acc_ref[...] + b_ref[...]                             # lane broadcast of bias

    # Sublane slices (offsets are multiples of 8) -> plain vreg selection.
    gi = gates[0 * hidden:1 * hidden, :]
    gf = gates[1 * hidden:2 * hidden, :]
    gc = gates[2 * hidden:3 * hidden, :]
    go = gates[3 * hidden:4 * hidden, :]

    def peep(idx):                                                # -> (Ch, TILE_M)
        p = peep_ref[idx * hidden:(idx + 1) * hidden, :]          # (Ch, H*W)
        if images_per_tile == 1:
            return p
        return jnp.concatenate([p] * images_per_tile, axis=1)     # broadcast over images

    c = c_ref[...]

    def sigmoid_exact(z):        # i/f gates feed the recurrent cell state -> exact
        return 1.0 / (1.0 + jnp.exp(-z))

    def sigmoid_approx(z):       # o gate only touches ch -> EUP approx reciprocal
        return pl.reciprocal(1.0 + jnp.exp(-z), approx=True)

    i_gate = sigmoid_exact(gi + c * peep(0))
    f_gate = sigmoid_exact(gf + c * peep(1))
    cc = f_gate * c + i_gate * jnp.maximum(gc, 0.0)               # relu candidate, as in module
    o_gate = sigmoid_approx(go + cc * peep(2))

    ch_ref[...] = (o_gate * jnp.maximum(cc, 0.0)).astype(ch_ref.dtype)  # bf16 out
    cc_ref[...] = cc


# ------------------------------ JAX glue -------------------------------------
def _shift_masks(h, w, k):
    """(k*k, h*w) bf16 {0,1}: tap s=(dy+r)*k+(dx+r) is valid inside the image."""
    r = (k - 1) // 2
    ys = jnp.repeat(jnp.arange(h), w)
    xs = jnp.tile(jnp.arange(w), h)
    rows = []
    for dy in range(-r, r + 1):
        for dx in range(-r, r + 1):
            rows.append((ys + dy >= 0) & (ys + dy < h) &
                        (xs + dx >= 0) & (xs + dx < w))
    return jnp.stack(rows, axis=0).astype(jnp.bfloat16)


def _pick_images_per_tile(n, hw, target_pixels=2048, min_steps=8):
    """Largest divisor of n with tile <= ~2K pixels while keeping >=8 grid
    steps when possible (v7x: 2 TCs need pipeline depth per core)."""
    best = 1
    for d in range(1, n + 1):
        if n % d:
            continue
        if d * hw > target_pixels:
            break
        if d == 1 or n // d >= min_steps:
            best = d
    return best


def prepare_convlstm_params(params, kernel_size):
    """Pack weights/bias/peepholes/masks once (hoist out of the per-step call)."""
    k = kernel_size
    chh = params["Whi"].shape[0]
    cin = params["Wxi"].shape[1]
    hh, ww = params["Wci"].shape[2], params["Wci"].shape[3]

    def gate_w(gx, gh):                       # -> (k*k, Ch, Ch+Cin), tap-major
        wcat = jnp.concatenate([params[gh], params[gx]], axis=1)   # (Ch, Ch+Cin, k, k)
        wcat = jnp.transpose(wcat, (2, 3, 0, 1))                   # (k, k, Ch, Ch+Cin)
        return wcat.reshape(k * k, chh, chh + cin)

    w_all = jnp.concatenate(
        [gate_w("Wxi", "Whi"), gate_w("Wxf", "Whf"),
         gate_w("Wxc", "Whc"), gate_w("Wxo", "Who")],
        axis=1).reshape(k * k * 4 * chh, chh + cin).astype(jnp.bfloat16)
    bias = jnp.concatenate(
        [params[g] for g in ("bxi", "bxf", "bxc", "bxo")]
    ).reshape(4 * chh, 1).astype(jnp.float32)
    peep = jnp.concatenate(
        [params[g].reshape(chh, hh * ww) for g in ("Wci", "Wcf", "Wco")],
        axis=0).astype(jnp.float32)                                # (3Ch, H*W)
    masks = _shift_masks(hh, ww, k)                                # (k*k, H*W)
    return dict(w=w_all, b=bias, peep=peep, masks=masks,
                cin=cin, hidden=chh, height=hh, width=ww, ksize=k)


def conv_lstm_cell_t(x_t, h_t, c_t, prep, *, images_per_tile=None):
    """ConvLSTM cell on the persistent transposed layout.

    x_t: (Cin, N*H*W), h_t: (Ch, N*H*W) (bf16 ok), c_t: (Ch, N*H*W) f32.
    Returns (ch_t bf16, cc_t f32) in the same layout, ready for the next step.
    """
    cin, chh = prep["cin"], prep["hidden"]
    hh, ww, k = prep["height"], prep["width"], prep["ksize"]
    hw = hh * ww
    m = x_t.shape[-1]
    assert m % hw == 0, "pixel axis must hold whole images"
    n = m // hw
    # TODO(synk): pad the pixel axis when H*W is not a multiple of 128 lanes.
    assert hw % 128 == 0, "H*W must be a multiple of the 128-lane width"
    bt = images_per_tile if images_per_tile is not None else _pick_images_per_tile(n, hw)
    assert n % bt == 0
    tile_m = bt * hw
    grid = (n // bt,)
    masks = prep["masks"] if bt == 1 else jnp.tile(prep["masks"], (1, bt))

    kernel = functools.partial(_convlstm_kernel, hidden=chh, width=ww,
                               ksize=k, images_per_tile=bt)
    kk = k * k
    # Constant index_maps (weights/bias/masks/peepholes): re-DMA elided across
    # grid steps.  TODO(synk): pipeline_mode=pl.Buffered(1) on these constant
    # blocks would trim a little more VMEM on v7x once tiles grow.
    grid_spec = pltpu.PrefetchScalarGridSpec(
        num_scalar_prefetch=0,
        grid=grid,
        in_specs=[
            pl.BlockSpec((kk * 4 * chh, chh + cin), lambda i: (0, 0)),  # weights
            pl.BlockSpec((4 * chh, 1), lambda i: (0, 0)),               # bias
            pl.BlockSpec((kk, tile_m), lambda i: (0, 0)),               # tap masks
            pl.BlockSpec((3 * chh, hw), lambda i: (0, 0)),              # peepholes
            pl.BlockSpec((chh, tile_m), lambda i: (0, i)),              # h
            pl.BlockSpec((cin, tile_m), lambda i: (0, i)),              # x
            pl.BlockSpec((chh, tile_m), lambda i: (0, i)),              # c
        ],
        out_specs=(
            pl.BlockSpec((chh, tile_m), lambda i: (0, i)),              # ch (bf16)
            pl.BlockSpec((chh, tile_m), lambda i: (0, i)),              # cc (f32)
        ),
        scratch_shapes=[pltpu.VMEM((4 * chh, tile_m), jnp.float32)],
    )
    ch_t, cc_t = pl.pallas_call(
        kernel,
        out_shape=(
            jax.ShapeDtypeStruct((chh, m), jnp.bfloat16),
            jax.ShapeDtypeStruct((chh, m), jnp.float32),
        ),
        grid_spec=grid_spec,
        compiler_params=pltpu.CompilerParams(
            dimension_semantics=("parallel",),        # shards across v7x's 2 TCs
            vmem_limit_bytes=32 * 1024 * 1024,        # fine on v5e/v6e/v7x at these tiles
        ),
    )(prep["w"], prep["b"], masks, prep["peep"],
      h_t.astype(jnp.bfloat16), x_t.astype(jnp.bfloat16),
      c_t.astype(jnp.float32))
    return ch_t, cc_t


def conv_lstm_cell(x_nchw, h_nchw, c_nchw, params, kernel_size, *,
                   images_per_tile=None):
    """Single-step NCHW convenience wrapper (matches ConvLSTMCell.forward).

    For a multi-step ConvLSTM, call prepare_convlstm_params() once and
    conv_lstm_cell_t() per step, keeping h/c/x in the transposed (C, N*H*W)
    layout so state tensors never round-trip NCHW between timesteps.
    """
    prep = prepare_convlstm_params(params, kernel_size)
    n, _, hh, ww = x_nchw.shape
    m = n * hh * ww

    def to_t(a):                                      # (N,C,H,W) -> (C, N*H*W)
        return jnp.transpose(a, (1, 0, 2, 3)).reshape(a.shape[1], m)

    ch_t, cc_t = conv_lstm_cell_t(to_t(x_nchw), to_t(h_nchw), to_t(c_nchw),
                                  prep, images_per_tile=images_per_tile)

    def back(a_t):                                    # (C, N*H*W) -> (N,C,H,W) f32
        a = a_t.astype(jnp.float32).reshape(a_t.shape[0], n, hh, ww)
        return jnp.transpose(a, (1, 0, 2, 3))

    return back(ch_t), back(cc_t)


# ------------------------- pure-JAX reference --------------------------------
def _conv_ref(a_nchw, w, b, pad):
    out = jax.lax.conv_general_dilated(
        a_nchw, w, window_strides=(1, 1),
        padding=[(pad, pad), (pad, pad)],
        dimension_numbers=("NCHW", "OIHW", "NCHW"),
        precision=jax.lax.Precision.HIGHEST)
    if b is not None:
        out = out + b.reshape(1, -1, 1, 1)
    return out


def conv_lstm_ref(x, h, c, p, k):
    pad = (k - 1) // 2
    ci = jax.nn.sigmoid(_conv_ref(x, p["Wxi"], p["bxi"], pad)
                        + _conv_ref(h, p["Whi"], None, pad) + c * p["Wci"])
    cf = jax.nn.sigmoid(_conv_ref(x, p["Wxf"], p["bxf"], pad)
                        + _conv_ref(h, p["Whf"], None, pad) + c * p["Wcf"])
    cc = cf * c + ci * jax.nn.relu(_conv_ref(x, p["Wxc"], p["bxc"], pad)
                                   + _conv_ref(h, p["Whc"], None, pad))
    co = jax.nn.sigmoid(_conv_ref(x, p["Wxo"], p["bxo"], pad)
                        + _conv_ref(h, p["Who"], None, pad) + cc * p["Wco"])
    ch = co * jax.nn.relu(cc)
    return ch, cc


# --------------------------------- main ---------------------------------------
if __name__ == "__main__":
    N, CIN, CH, H, W, K = 2, 4, 32, 16, 16, 3

    key = jax.random.PRNGKey(0)
    keys = jax.random.split(key, 20)

    def nrm(kk, shape, scale=0.1):
        return (scale * jax.random.normal(kk, shape)).astype(jnp.float32)

    # Deterministic synthetic parameters (shapes from ConvLSTMCell.__init__).
    # NOTE: PyTorch's init_hidden() zeros Wci/Wcf/Wco; we use small random
    # values here so the peephole terms are actually exercised by the test.
    params = {
        "Wxi": nrm(keys[0], (CH, CIN, K, K)), "bxi": nrm(keys[1], (CH,)),
        "Wxf": nrm(keys[2], (CH, CIN, K, K)), "bxf": nrm(keys[3], (CH,)),
        "Wxc": nrm(keys[4], (CH, CIN, K, K)), "bxc": nrm(keys[5], (CH,)),
        "Wxo": nrm(keys[6], (CH, CIN, K, K)), "bxo": nrm(keys[7], (CH,)),
        "Whi": nrm(keys[8], (CH, CH, K, K)),
        "Whf": nrm(keys[9], (CH, CH, K, K)),
        "Whc": nrm(keys[10], (CH, CH, K, K)),
        "Who": nrm(keys[11], (CH, CH, K, K)),
        "Wci": nrm(keys[12], (1, CH, H, W)),
        "Wcf": nrm(keys[13], (1, CH, H, W)),
        "Wco": nrm(keys[14], (1, CH, H, W)),
    }

    x = nrm(keys[15], (N, CIN, H, W), 1.0)
    h = nrm(keys[16], (N, CH, H, W), 1.0)
    c = nrm(keys[17], (N, CH, H, W), 1.0)

    ch_out, cc_out = conv_lstm_cell(x, h, c, params, K)
    jax.block_until_ready((ch_out, cc_out))

    ch_ref, cc_ref = conv_lstm_ref(x, h, c, params, K)
    assert ch_out.shape == (N, CH, H, W) and cc_out.shape == (N, CH, H, W)
    # bf16 MXU operands and bf16 ch output (f32 accumulation / gating) -> 2e-2.
    assert jnp.allclose(ch_out, ch_ref, atol=2e-2, rtol=2e-2)
    assert jnp.allclose(cc_out, cc_ref, atol=2e-2, rtol=2e-2)

    print("KERNEL_OK")
</pallas_src>

<mosaic_0001>
module attributes {stable_mosaic.version = 11 : i64} {
  func.func @_convlstm_kernel(%arg0: i32, %arg1: memref<1152x36xbf16, #tpu.memory_space<vmem>>, %arg2: memref<128x1xf32, #tpu.memory_space<vmem>>, %arg3: memref<9x256xbf16, #tpu.memory_space<vmem>>, %arg4: memref<96x256xf32, #tpu.memory_space<vmem>>, %arg5: memref<32x256xbf16, #tpu.memory_space<vmem>>, %arg6: memref<4x256xbf16, #tpu.memory_space<vmem>>, %arg7: memref<32x256xf32, #tpu.memory_space<vmem>>, %arg8: memref<32x256xbf16, #tpu.memory_space<vmem>>, %arg9: memref<32x256xf32, #tpu.memory_space<vmem>>, %arg10: memref<128x256xf32, #tpu.memory_space<vmem>>) attributes {dimension_semantics = [#tpu.dimension_semantics<parallel>], iteration_bounds = array<i64: 2>, scalar_prefetch = 0 : i64, scratch_operands = 1 : i64, tpu.core_type = #tpu.core_type<tc>, window_params = [{pipeline_mode = #tpu.pipeline_mode<synchronous>, transform_indices = @transform_0, window_bounds = array<i64: 1152, 36>}, {pipeline_mode = #tpu.pipeline_mode<synchronous>, transform_indices = @transform_1, window_bounds = array<i64: 128, 1>}, {pipeline_mode = #tpu.pipeline_mode<synchronous>, transform_indices = @transform_2, window_bounds = array<i64: 9, 256>}, {pipeline_mode = #tpu.pipeline_mode<synchronous>, transform_indices = @transform_3, window_bounds = array<i64: 96, 256>}, {transform_indices = @transform_4, window_bounds = array<i64: 32, 256>}, {transform_indices = @transform_5, window_bounds = array<i64: 4, 256>}, {transform_indices = @transform_6, window_bounds = array<i64: 32, 256>}, {transform_indices = @transform_7, window_bounds = array<i64: 32, 256>}, {transform_indices = @transform_8, window_bounds = array<i64: 32, 256>}]} {
    %c0 = arith.constant 0 : index
    %c0_0 = arith.constant 0 : index
    %0 = vector.load %arg5[%c0, %c0_0] : memref<32x256xbf16, #tpu.memory_space<vmem>>, vector<32x256xbf16>
    %c0_1 = arith.constant 0 : index
    %c0_2 = arith.constant 0 : index
    %1 = vector.load %arg6[%c0_1, %c0_2] : memref<4x256xbf16, #tpu.memory_space<vmem>>, vector<4x256xbf16>
    %2 = tpu.concatenate %0, %1 in 0 : vector<32x256xbf16>, vector<4x256xbf16> -> vector<36x256xbf16>
    %cst = arith.constant 0.000000e+00 : bf16
    %3 = vector.broadcast %cst : bf16 to vector<36x128xbf16>
    %4 = tpu.concatenate %3, %2, %3 in 1 : vector<36x128xbf16>, vector<36x256xbf16>, vector<36x128xbf16> -> vector<36x512xbf16>
    %5 = vector.extract_strided_slice %4 {offsets = [0, 111], sizes = [36, 256], strides = [1, 1]} : vector<36x512xbf16> to vector<36x256xbf16>
    %c0_3 = arith.constant 0 : index
    %c0_4 = arith.constant 0 : index
    %6 = vector.load %arg3[%c0_3, %c0_4] : memref<9x256xbf16, #tpu.memory_space<vmem>>, vector<1x256xbf16>
    %7 = vector.broadcast %6 : vector<1x256xbf16> to vector<36x256xbf16>
    %8 = arith.mulf %5, %7 : vector<36x256xbf16>
    %c0_5 = arith.constant 0 : index
    %c0_6 = arith.constant 0 : index
    %9 = vector.load %arg1[%c0_5, %c0_6] : memref<1152x36xbf16, #tpu.memory_space<vmem>>, vector<128x36xbf16>
    %cst_7 = arith.constant dense<0.000000e+00> : vector<128x256xf32>
    %10 = tpu.matmul %9, %8, %cst_7 {dimension_numbers = #tpu.dot_dimension_numbers<[1], [0], [0], [1], [0, 0, 1, 1], [], []>} : vector<128x36xbf16>, vector<36x256xbf16>, vector<128x256xf32> -> vector<128x256xf32>
    %c0_8 = arith.constant 0 : index
    %c0_9 = arith.constant 0 : index
    %11 = vector.load %arg10[%c0_8, %c0_9] : memref<128x256xf32, #tpu.memory_space<vmem>>, vector<128x256xf32>
    tpu.vector_store %arg10[%c0_8, %c0_9], %10 {strides = array<i32>} : memref<128x256xf32, #tpu.memory_space<vmem>>, vector<128x256xf32>,
    %12 = vector.extract_strided_slice %4 {offsets = [0, 112], sizes = [36, 256], strides = [1, 1]} : vector<36x512xbf16> to vector<36x256xbf16>
    %c1 = arith.constant 1 : index
    %c0_10 = arith.constant 0 : index
    %13 = vector.load %arg3[%c1, %c0_10] : memref<9x256xbf16, #tpu.memory_space<vmem>>, vector<1x256xbf16>
    %14 = vector.broadcast %13 : vector<1x256xbf16> to vector<36x256xbf16>
    %15 = arith.mulf %12, %14 : vector<36x256xbf16>
    %c128 = arith.constant 128 : index
    %c0_11 = arith.constant 0 : index
    %16 = vector.load %arg1[%c128, %c0_11] : memref<1152x36xbf16, #tpu.memory_space<vmem>>, vector<128x36xbf16>
    %cst_12 = arith.constant dense<0.000000e+00> : vector<128x256xf32>
    %17 = tpu.matmul %16, %15, %cst_12 {dimension_numbers = #tpu.dot_dimension_numbers<[1], [0], [0], [1], [0, 0, 1, 1], [], []>} : vector<128x36xbf16>, vector<36x256xbf16>, vector<128x256xf32> -> vector<128x256xf32>
    %c0_13 = arith.constant 0 : index
    %c0_14 = arith.constant 0 : index
    %18 = vector.load %arg10[%c0_13, %c0_14] : memref<128x256xf32, #tpu.memory_space<vmem>>, vector<128x256xf32>
    %19 = arith.addf %18, %17 : vector<128x256xf32>
    %c0_15 = arith.constant 0 : index
    %c0_16 = arith.constant 0 : index
    %20 = vector.load %arg10[%c0_15, %c0_16] : memref<128x256xf32, #tpu.memory_space<vmem>>, vector<128x256xf32>
    tpu.vector_store %arg10[%c0_15, %c0_16], %19 {strides = array<i32>} : memref<128x256xf32, #tpu.memory_space<vmem>>, vector<128x256xf32>,
    %21 = vector.extract_strided_slice %4 {offsets = [0, 113], sizes = [36, 256], strides = [1, 1]} : vector<36x512xbf16> to vector<36x256xbf16>
    %c2 = arith.constant 2 : index
    %c0_17 = arith.constant 0 : index
    %22 = vector.load %arg3[%c2, %c0_17] : memref<9x256xbf16, #tpu.memory_space<vmem>>, vector<1x256xbf16>
    %23 = vector.broadcast %22 : vector<1x256xbf16> to vector<36x256xbf16>
    %24 = arith.mulf %21, %23 : vector<36x256xbf16>
    %c256 = arith.constant 256 : index
    %c0_18 = arith.constant 0 : index
    %25 = vector.load %arg1[%c256, %c0_18] : memref<1152x36xbf16, #tpu.memory_space<vmem>>, vector<128x36xbf16>
    %cst_19 = arith.constant dense<0.000000e+00> : vector<128x256xf32>
    %26 = tpu.matmul %25, %24, %cst_19 {dimension_numbers = #tpu.dot_dimension_numbers<[1], [0], [0], [1], [0, 0, 1, 1], [], []>} : vector<128x36xbf16>, vector<36x256xbf16>, vector<128x256xf32> -> vector<128x256xf32>
    %c0_20 = arith.constant 0 : index
    %c0_21 = arith.constant 0 : index
    %27 = vector.load %arg10[%c0_20, %c0_21] : memref<128x256xf32, #tpu.memory_space<vmem>>, vector<128x256xf32>
    %28 = arith.addf %27, %26 : vector<128x256xf32>
    %c0_22 = arith.constant 0 : index
    %c0_23 = arith.constant 0 : index
    %29 = vector.load %arg10[%c0_22, %c0_23] : memref<128x256xf32, #tpu.memory_space<vmem>>, vector<128x256xf32>
    tpu.vector_store %arg10[%c0_22, %c0_23], %28 {strides = array<i32>} : memref<128x256xf32, #tpu.memory_space<vmem>>, vector<128x256xf32>,
    %30 = vector.extract_strided_slice %4 {offsets = [0, 127], sizes = [36, 256], strides = [1, 1]} : vector<36x512xbf16> to vector<36x256xbf16>
    %c3 = arith.constant 3 : index
    %c0_24 = arith.constant 0 : index
    %31 = vector.load %arg3[%c3, %c0_24] : memref<9x256xbf16, #tpu.memory_space<vmem>>, vector<1x256xbf16>
    %32 = vector.broadcast %31 : vector<1x256xbf16> to vector<36x256xbf16>
    %33 = arith.mulf %30, %32 : vector<36x256xbf16>
    %c384 = arith.constant 384 : index
    %c0_25 = arith.constant 0 : index
    %34 = vector.load %arg1[%c384, %c0_25] : memref<1152x36xbf16, #tpu.memory_space<vmem>>, vector<128x36xbf16>
    %cst_26 = arith.constant dense<0.000000e+00> : vector<128x256xf32>
    %35 = tpu.matmul %34, %33, %cst_26 {dimension_numbers = #tpu.dot_dimension_numbers<[1], [0], [0], [1], [0, 0, 1, 1], [], []>} : vector<128x36xbf16>, vector<36x256xbf16>, vector<128x256xf32> -> vector<128x256xf32>
    %c0_27 = arith.constant 0 : index
    %c0_28 = arith.constant 0 : index
    %36 = vector.load %arg10[%c0_27, %c0_28] : memref<128x256xf32, #tpu.memory_space<vmem>>, vector<128x256xf32>
    %37 = arith.addf %36, %35 : vector<128x256xf32>
    %c0_29 = arith.constant 0 : index
    %c0_30 = arith.constant 0 : index
    %38 = vector.load %arg10[%c0_29, %c0_30] : memref<128x256xf32, #tpu.memory_space<vmem>>, vector<128x256xf32>
    tpu.vector_store %arg10[%c0_29, %c0_30], %37 {strides = array<i32>} : memref<128x256xf32, #tpu.memory_space<vmem>>, vector<128x256xf32>,
    %39 = vector.extract_strided_slice %4 {offsets = [0, 128], sizes = [36, 256], strides = [1, 1]} : vector<36x512xbf16> to vector<36x256xbf16>
    %c4 = arith.constant 4 : index
    %c0_31 = arith.constant 0 : index
    %40 = vector.load %arg3[%c4, %c0_31] : memref<9x256xbf16, #tpu.memory_space<vmem>>, vector<1x256xbf16>
    %41 = vector.broadcast %40 : vector<1x256xbf16> to vector<36x256xbf16>
    %42 = arith.mulf %39, %41 : vector<36x256xbf16>
    %c512 = arith.constant 512 : index
    %c0_32 = arith.constant 0 : index
    %43 = vector.load %arg1[%c512, %c0_32] : memref<1152x36xbf16, #tpu.memory_space<vmem>>, vector<128x36xbf16>
    %cst_33 = arith.constant dense<0.000000e+00> : vector<128x256xf32>
    %44 = tpu.matmul %43, %42, %cst_33 {dimension_numbers = #tpu.dot_dimension_numbers<[1], [0], [0], [1], [0, 0, 1, 1], [], []>} : vector<128x36xbf16>, vector<36x256xbf16>, vector<128x256xf32> -> vector<128x256xf32>
    %c0_34 = arith.constant 0 : index
    %c0_35 = arith.constant 0 : index
    %45 = vector.load %arg10[%c0_34, %c0_35] : memref<128x256xf32, #tpu.memory_space<vmem>>, vector<128x256xf32>
    %46 = arith.addf %45, %44 : vector<128x256xf32>
    %c0_36 = arith.constant 0 : index
    %c0_37 = arith.constant 0 : index
    %47 = vector.load %arg10[%c0_36, %c0_37] : memref<128x256xf32, #tpu.memory_space<vmem>>, vector<128x256xf32>
    tpu.vector_store %arg10[%c0_36, %c0_37], %46 {strides = array<i32>} : memref<128x256xf32, #tpu.memory_space<vmem>>, vector<128x256xf32>,
    %48 = vector.extract_strided_slice %4 {offsets = [0, 129], sizes = [36, 256], strides = [1, 1]} : vector<36x512xbf16> to vector<36x256xbf16>
    %c5 = arith.constant 5 : index
    %c0_38 = arith.constant 0 : index
    %49 = vector.load %arg3[%c5, %c0_38] : memref<9x256xbf16, #tpu.memory_space<vmem>>, vector<1x256xbf16>
    %50 = vector.broadcast %49 : vector<1x256xbf16> to vector<36x256xbf16>
    %51 = arith.mulf %48, %50 : vector<36x256xbf16>
    %c640 = arith.constant 640 : index
    %c0_39 = arith.constant 0 : index
    %52 = vector.load %arg1[%c640, %c0_39] : memref<1152x36xbf16, #tpu.memory_space<vmem>>, vector<128x36xbf16>
    %cst_40 = arith.constant dense<0.000000e+00> : vector<128x256xf32>
    %53 = tpu.matmul %52, %51, %cst_40 {dimension_numbers = #tpu.dot_dimension_numbers<[1], [0], [0], [1], [0, 0, 1, 1], [], []>} : vector<128x36xbf16>, vector<36x256xbf16>, vector<128x256xf32> -> vector<128x256xf32>
    %c0_41 = arith.constant 0 : index
    %c0_42 = arith.constant 0 : index
    %54 = vector.load %arg10[%c0_41, %c0_42] : memref<128x256xf32, #tpu.memory_space<vmem>>, vector<128x256xf32>
    %55 = arith.addf %54, %53 : vector<128x256xf32>
    %c0_43 = arith.constant 0 : index
    %c0_44 = arith.constant 0 : index
    %56 = vector.load %arg10[%c0_43, %c0_44] : memref<128x256xf32, #tpu.memory_space<vmem>>, vector<128x256xf32>
    tpu.vector_store %arg10[%c0_43, %c0_44], %55 {strides = array<i32>} : memref<128x256xf32, #tpu.memory_space<vmem>>, vector<128x256xf32>,
    %57 = vector.extract_strided_slice %4 {offsets = [0, 143], sizes = [36, 256], strides = [1, 1]} : vector<36x512xbf16> to vector<36x256xbf16>
    %c6 = arith.constant 6 : index
    %c0_45 = arith.constant 0 : index
    %58 = vector.load %arg3[%c6, %c0_45] : memref<9x256xbf16, #tpu.memory_space<vmem>>, vector<1x256xbf16>
    %59 = vector.broadcast %58 : vector<1x256xbf16> to vector<36x256xbf16>
    %60 = arith.mulf %57, %59 : vector<36x256xbf16>
    %c768 = arith.constant 768 : index
    %c0_46 = arith.constant 0 : index
    %61 = vector.load %arg1[%c768, %c0_46] : memref<1152x36xbf16, #tpu.memory_space<vmem>>, vector<128x36xbf16>
    %cst_47 = arith.constant dense<0.000000e+00> : vector<128x256xf32>
    %62 = tpu.matmul %61, %60, %cst_47 {dimension_numbers = #tpu.dot_dimension_numbers<[1], [0], [0], [1], [0, 0, 1, 1], [], []>} : vector<128x36xbf16>, vector<36x256xbf16>, vector<128x256xf32> -> vector<128x256xf32>
    %c0_48 = arith.constant 0 : index
    %c0_49 = arith.constant 0 : index
    %63 = vector.load %arg10[%c0_48, %c0_49] : memref<128x256xf32, #tpu.memory_space<vmem>>, vector<128x256xf32>
    %64 = arith.addf %63, %62 : vector<128x256xf32>
    %c0_50 = arith.constant 0 : index
    %c0_51 = arith.constant 0 : index
    %65 = vector.load %arg10[%c0_50, %c0_51] : memref<128x256xf32, #tpu.memory_space<vmem>>, vector<128x256xf32>
    tpu.vector_store %arg10[%c0_50, %c0_51], %64 {strides = array<i32>} : memref<128x256xf32, #tpu.memory_space<vmem>>, vector<128x256xf32>,
    %66 = vector.extract_strided_slice %4 {offsets = [0, 144], sizes = [36, 256], strides = [1, 1]} : vector<36x512xbf16> to vector<36x256xbf16>
    %c7 = arith.constant 7 : index
    %c0_52 = arith.constant 0 : index
    %67 = vector.load %arg3[%c7, %c0_52] : memref<9x256xbf16, #tpu.memory_space<vmem>>, vector<1x256xbf16>
    %68 = vector.broadcast %67 : vector<1x256xbf16> to vector<36x256xbf16>
    %69 = arith.mulf %66, %68 : vector<36x256xbf16>
    %c896 = arith.constant 896 : index
    %c0_53 = arith.constant 0 : index
    %70 = vector.load %arg1[%c896, %c0_53] : memref<1152x36xbf16, #tpu.memory_space<vmem>>, vector<128x36xbf16>
    %cst_54 = arith.constant dense<0.000000e+00> : vector<128x256xf32>
    %71 = tpu.matmul %70, %69, %cst_54 {dimension_numbers = #tpu.dot_dimension_numbers<[1], [0], [0], [1], [0, 0, 1, 1], [], []>} : vector<128x36xbf16>, vector<36x256xbf16>, vector<128x256xf32> -> vector<128x256xf32>
    %c0_55 = arith.constant 0 : index
    %c0_56 = arith.constant 0 : index
    %72 = vector.load %arg10[%c0_55, %c0_56] : memref<128x256xf32, #tpu.memory_space<vmem>>, vector<128x256xf32>
    %73 = arith.addf %72, %71 : vector<128x256xf32>
    %c0_57 = arith.constant 0 : index
    %c0_58 = arith.constant 0 : index
    %74 = vector.load %arg10[%c0_57, %c0_58] : memref<128x256xf32, #tpu.memory_space<vmem>>, vector<128x256xf32>
    tpu.vector_store %arg10[%c0_57, %c0_58], %73 {strides = array<i32>} : memref<128x256xf32, #tpu.memory_space<vmem>>, vector<128x256xf32>,
    %75 = vector.extract_strided_slice %4 {offsets = [0, 145], sizes = [36, 256], strides = [1, 1]} : vector<36x512xbf16> to vector<36x256xbf16>
    %c8 = arith.constant 8 : index
    %c0_59 = arith.constant 0 : index
    %76 = vector.load %arg3[%c8, %c0_59] : memref<9x256xbf16, #tpu.memory_space<vmem>>, vector<1x256xbf16>
    %77 = vector.broadcast %76 : vector<1x256xbf16> to vector<36x256xbf16>
    %78 = arith.mulf %75, %77 : vector<36x256xbf16>
    %c1024 = arith.constant 1024 : index
    %c0_60 = arith.constant 0 : index
    %79 = vector.load %arg1[%c1024, %c0_60] : memref<1152x36xbf16, #tpu.memory_space<vmem>>, vector<128x36xbf16>
    %cst_61 = arith.constant dense<0.000000e+00> : vector<128x256xf32>
    %80 = tpu.matmul %79, %78, %cst_61 {dimension_numbers = #tpu.dot_dimension_numbers<[1], [0], [0], [1], [0, 0, 1, 1], [], []>} : vector<128x36xbf16>, vector<36x256xbf16>, vector<128x256xf32> -> vector<128x256xf32>
    %c0_62 = arith.constant 0 : index
    %c0_63 = arith.constant 0 : index
    %81 = vector.load %arg10[%c0_62, %c0_63] : memref<128x256xf32, #tpu.memory_space<vmem>>, vector<128x256xf32>
    %82 = arith.addf %81, %80 : vector<128x256xf32>
    %c0_64 = arith.constant 0 : index
    %c0_65 = arith.constant 0 : index
    %83 = vector.load %arg10[%c0_64, %c0_65] : memref<128x256xf32, #tpu.memory_space<vmem>>, vector<128x256xf32>
    tpu.vector_store %arg10[%c0_64, %c0_65], %82 {strides = array<i32>} : memref<128x256xf32, #tpu.memory_space<vmem>>, vector<128x256xf32>,
    %c0_66 = arith.constant 0 : index
    %c0_67 = arith.constant 0 : index
    %84 = vector.load %arg10[%c0_66, %c0_67] : memref<128x256xf32, #tpu.memory_space<vmem>>, vector<128x256xf32>
    %c0_68 = arith.constant 0 : index
    %c0_69 = arith.constant 0 : index
    %85 = vector.load %arg2[%c0_68, %c0_69] : memref<128x1xf32, #tpu.memory_space<vmem>>, vector<128x1xf32>
    %86 = vector.broadcast %85 : vector<128x1xf32> to vector<128x256xf32>
    %87 = arith.addf %84, %86 : vector<128x256xf32>
    %88 = vector.extract_strided_slice %87 {offsets = [0, 0], sizes = [32, 256], strides = [1, 1]} : vector<128x256xf32> to vector<32x256xf32>
    %89 = vector.extract_strided_slice %87 {offsets = [32, 0], sizes = [32, 256], strides = [1, 1]} : vector<128x256xf32> to vector<32x256xf32>
    %90 = vector.extract_strided_slice %87 {offsets = [64, 0], sizes = [32, 256], strides = [1, 1]} : vector<128x256xf32> to vector<32x256xf32>
    %91 = vector.extract_strided_slice %87 {offsets = [96, 0], sizes = [32, 256], strides = [1, 1]} : vector<128x256xf32> to vector<32x256xf32>
    %c0_70 = arith.constant 0 : index
    %c0_71 = arith.constant 0 : index
    %92 = vector.load %arg7[%c0_70, %c0_71] : memref<32x256xf32, #tpu.memory_space<vmem>>, vector<32x256xf32>
    %c0_72 = arith.constant 0 : index
    %c0_73 = arith.constant 0 : index
    %93 = vector.load %arg4[%c0_72, %c0_73] : memref<96x256xf32, #tpu.memory_space<vmem>>, vector<32x256xf32>
    %94 = arith.mulf %92, %93 : vector<32x256xf32>
    %95 = arith.addf %88, %94 : vector<32x256xf32>
    %cst_74 = arith.constant 0.000000e+00 : f32
    %96 = vector.broadcast %cst_74 : f32 to vector<32x256xf32>
    %97 = arith.subf %96, %95 : vector<32x256xf32>
    %98 = math.exp %97 : vector<32x256xf32>
    %cst_75 = arith.constant 1.000000e+00 : f32
    %99 = vector.broadcast %cst_75 : f32 to vector<32x256xf32>
    %100 = arith.addf %99, %98 : vector<32x256xf32>
    %cst_76 = arith.constant 1.000000e+00 : f32
    %101 = vector.broadcast %cst_76 : f32 to vector<32x256xf32>
    %102 = arith.divf %101, %100 : vector<32x256xf32>
    %c32 = arith.constant 32 : index
    %c0_77 = arith.constant 0 : index
    %103 = vector.load %arg4[%c32, %c0_77] : memref<96x256xf32, #tpu.memory_space<vmem>>, vector<32x256xf32>
    %104 = arith.mulf %92, %103 : vector<32x256xf32>
    %105 = arith.addf %89, %104 : vector<32x256xf32>
    %cst_78 = arith.constant 0.000000e+00 : f32
    %106 = vector.broadcast %cst_78 : f32 to vector<32x256xf32>
    %107 = arith.subf %106, %105 : vector<32x256xf32>
    %108 = math.exp %107 : vector<32x256xf32>
    %cst_79 = arith.constant 1.000000e+00 : f32
    %109 = vector.broadcast %cst_79 : f32 to vector<32x256xf32>
    %110 = arith.addf %109, %108 : vector<32x256xf32>
    %cst_80 = arith.constant 1.000000e+00 : f32
    %111 = vector.broadcast %cst_80 : f32 to vector<32x256xf32>
    %112 = arith.divf %111, %110 : vector<32x256xf32>
    %113 = arith.mulf %112, %92 : vector<32x256xf32>
    %cst_81 = arith.constant 0.000000e+00 : f32
    %114 = vector.broadcast %cst_81 : f32 to vector<32x256xf32>
    %115 = arith.maximumf %90, %114 : vector<32x256xf32>
    %116 = arith.mulf %102, %115 : vector<32x256xf32>
    %117 = arith.addf %113, %116 : vector<32x256xf32>
    %c64 = arith.constant 64 : index
    %c0_82 = arith.constant 0 : index
    %118 = vector.load %arg4[%c64, %c0_82] : memref<96x256xf32, #tpu.memory_space<vmem>>, vector<32x256xf32>
    %119 = arith.mulf %117, %118 : vector<32x256xf32>
    %120 = arith.addf %91, %119 : vector<32x256xf32>
    %cst_83 = arith.constant 0.000000e+00 : f32
    %121 = vector.broadcast %cst_83 : f32 to vector<32x256xf32>
    %122 = arith.subf %121, %120 : vector<32x256xf32>
    %123 = math.exp %122 : vector<32x256xf32>
    %cst_84 = arith.constant 1.000000e+00 : f32
    %124 = vector.broadcast %cst_84 : f32 to vector<32x256xf32>
    %125 = arith.addf %124, %123 : vector<32x256xf32>
    %126 = tpu.reciprocal %125 {approx = true} : vector<32x256xf32> -> vector<32x256xf32>
    %cst_85 = arith.constant 0.000000e+00 : f32
    %127 = vector.broadcast %cst_85 : f32 to vector<32x256xf32>
    %128 = arith.maximumf %117, %127 : vector<32x256xf32>
    %129 = arith.mulf %126, %128 : vector<32x256xf32>
    %130 = arith.truncf %129 : vector<32x256xf32> to vector<32x256xbf16>
    %c0_86 = arith.constant 0 : index
    %c0_87 = arith.constant 0 : index
    %131 = vector.load %arg8[%c0_86, %c0_87] : memref<32x256xbf16, #tpu.memory_space<vmem>>, vector<32x256xbf16>
    tpu.vector_store %arg8[%c0_86, %c0_87], %130 {strides = array<i32>} : memref<32x256xbf16, #tpu.memory_space<vmem>>, vector<32x256xbf16>,
    %c0_88 = arith.constant 0 : index
    %c0_89 = arith.constant 0 : index
    %132 = vector.load %arg9[%c0_88, %c0_89] : memref<32x256xf32, #tpu.memory_space<vmem>>, vector<32x256xf32>
    tpu.vector_store %arg9[%c0_88, %c0_89], %117 {strides = array<i32>} : memref<32x256xf32, #tpu.memory_space<vmem>>, vector<32x256xf32>,
    return
  }
  func.func @transform_0(%arg0: i32) -> (i32, i32) {
    %c0_i32 = arith.constant 0 : i32
    %c0_i32_0 = arith.constant 0 : i32
    %c0_i32_1 = arith.constant 0 : i32
    return %c0_i32, %c0_i32_0 : i32, i32
  }
  func.func @transform_1(%arg0: i32) -> (i32, i32) {
    %c0_i32 = arith.constant 0 : i32
    %c0_i32_0 = arith.constant 0 : i32
    %c0_i32_1 = arith.constant 0 : i32
    return %c0_i32, %c0_i32_0 : i32, i32
  }
  func.func @transform_2(%arg0: i32) -> (i32, i32) {
    %c0_i32 = arith.constant 0 : i32
    %c0_i32_0 = arith.constant 0 : i32
    %c0_i32_1 = arith.constant 0 : i32
    return %c0_i32, %c0_i32_0 : i32, i32
  }
  func.func @transform_3(%arg0: i32) -> (i32, i32) {
    %c0_i32 = arith.constant 0 : i32
    %c0_i32_0 = arith.constant 0 : i32
    %c0_i32_1 = arith.constant 0 : i32
    return %c0_i32, %c0_i32_0 : i32, i32
  }
  func.func @transform_4(%arg0: i32) -> (i32, i32) {
    %c0_i32 = arith.constant 0 : i32
    %c0_i32_0 = arith.constant 0 : i32
    return %c0_i32, %arg0 : i32, i32
  }
  func.func @transform_5(%arg0: i32) -> (i32, i32) {
    %c0_i32 = arith.constant 0 : i32
    %c0_i32_0 = arith.constant 0 : i32
    return %c0_i32, %arg0 : i32, i32
  }
  func.func @transform_6(%arg0: i32) -> (i32, i32) {
    %c0_i32 = arith.constant 0 : i32
    %c0_i32_0 = arith.constant 0 : i32
    return %c0_i32, %arg0 : i32, i32
  }
  func.func @transform_7(%arg0: i32) -> (i32, i32) {
    %c0_i32 = arith.constant 0 : i32
    %c0_i32_0 = arith.constant 0 : i32
    return %c0_i32, %arg0 : i32, i32
  }
  func.func @transform_8(%arg0: i32) -> (i32, i32) {
    %c0_i32 = arith.constant 0 : i32
    %c0_i32_0 = arith.constant 0 : i32
    return %c0_i32, %arg0 : i32, i32
  }
}

</mosaic_0001>

<bundles_post_ra>
// kernel: tpu_custom_call.1
= control target key start
LH: loop header
LB: loop body
LE: loop exit
PB: predicated region body
PF: predicated region fallthrough
CT: control target
= control target key end

     0   :  { %14 = vsyncpa [#allocation6], 0  ;;  %s6337_s0 = inlined_call_operand.vmem [shape: bf16[1152,36], index: 0, kind: input, shape index: {}]   ;;  %s6338_s1 = inlined_call_operand.vmem [shape: f32[128,1], index: 1, kind: input, shape index: {}]   ;;  %s6339_s2 = inlined_call_operand.vmem [shape: bf16[9,256], index: 2, kind: input, shape index: {}]   ;;  %s6340_s3 = inlined_call_operand.vmem [shape: f32[96,256], index: 3, kind: input, shape index: {}]   ;;  %s6341_s4 = inlined_call_operand.vmem [shape: bf16[32,512], index: 4, kind: input, shape index: {}]   ;;  %s6342_s5 = inlined_call_operand.vmem [shape: bf16[4,512], index: 5, kind: input, shape index: {}]   ;;  %s6343_s6 = inlined_call_operand.vmem [shape: f32[32,512], index: 6, kind: input, shape index: {}]   ;;  %s6344_s7 = inlined_call_operand.hbm [shape: bf16[32,512], index: 7, kind: output, shape index: {0}]   ;;  %s6345_s8 = inlined_call_operand.hbm [shape: f32[32,512], index: 8, kind: output, shape index: {1}]  }
   0x1   :  { %16 = vsyncpa [#allocation6 + $0x1], 0 }
   0x2   :  { %17 = vsyncpa [#allocation8], 0 }
   0x3   :  { %19 = vsyncpa [#allocation8 + $0x1], 0  ;;  %s5164_s27 = smov 0   ;;  %s5166_s28 = smov 0  }
   0x4   :  { %s5168_s29 = smov 0   ;;  %s5170_s30 = smov 0  }
   0x5 LB: > { %s5185_s9 = sadd.s32 4294967295, %s5102_s30   ;;  %s4283_s10 = sadd.s32 4294967294, %s5102_s30   ;;  %s5102_s30 = sphi %s5170_s30, %s6360_s30   ;;  %s5098_s29 = sphi %s5168_s29, %s6359_s29   ;;  %s5094_s28 = sphi %s5166_s28, %s6358_s28   ;;  %s5090_s27 = sphi %s5164_s27, %s6357_s27  }
   0x6   : > { %s5189_s11 = sadd.s32 1, %s5102_s30   ;;  %s116_s12 = sadd.s32 1, %s5098_s29 }
   0x7   : > { %s113_s13 = ssub.s32 %s5102_s30, %s5189_s11  ;;  %p123_p0 = scmp.ne.s32.totalorder %s5098_s29, %s5094_s28 }
   0x8   : > { %p114_p1 = scmp.eq.s32.totalorder %s113_s13, 0  ;;  %p124_p2 = scmp.eq.s32.totalorder %s5102_s30, 0 }
   0x9   : > { %p205_p3 = scmp.eq.s32.totalorder %s5185_s9, 1  ;;  %p210_p4 = scmp.ne.s32.totalorder %s5094_s28, %s5090_s27 }
   0xa   : > { %s5201_s14 = scalar_select %p114_p1, %s5098_s29, %s116_s12  }
   0xb   : > { %p5203_p5 = por %p124_p2, %p123_p0  ;;  %p5207_p6 = por %p205_p3, %p123_p0 }
   0xc   : > { %p211_p7 = scmp.eq.s32.totalorder %s4283_s10, 1  ;;  %p4285_p9 = scmp.ge.s32.totalorder %s5102_s30, 2 }
   0xe   : > { %p5211_p8 = por %p211_p7, %p210_p4  ;;  %265 = sbr.rel (%p4285_p9) target bundleno = 36 (0x24), region = 32 }
  0x15   : > { %268 = sbr.rel (!%p5203_p5) target bundleno = 28 (0x1c), region = 36  ;;  %s270_s18 = sand.u32 (%p5203_p5), 1, %s5098_s29  }
  0x16   : > { %s4487_s19 = sshll.u32 (%p5203_p5), %s5102_s30, 3  ;;  %s4286_s20 = sshll.u32 (%p5203_p5), %s270_s18, 5 }
  0x17   : > { %s275_s23 = scalar_lea.vmem (%p5203_p5), %s6341_s4, %s4487_s19  ;;  %s272_s24 = scalar_lea.vmem (%p5203_p5), [#allocation3], %s4286_s20 }
  0x18   : > { %v309_v0 = vld [vmem:[%s275_s23] sm:$0xff] (%p5203_p5)  ;;  %v311_v1 = vld [vmem:[%s275_s23 + $0x10] sm:$0xff] (%p5203_p5) }
  0x19   : > { %v313_v2 = vld [vmem:[%s275_s23 + $0x20] sm:$0xff] (%p5203_p5)  ;;  %310 = vst [vmem:[%s272_s24] sm:$0xff] (%p5203_p5), %v309_v0  ;;  %312 = vst [vmem:[%s272_s24 + $0x8] sm:$0xff] (%p5203_p5), %v311_v1  ;;  %v315_v3 = vld [vmem:[%s275_s23 + $0x30] sm:$0xff] (%p5203_p5) }
  0x1a   : > { %314 = vst [vmem:[%s272_s24 + $0x10] sm:$0xff] (%p5203_p5), %v313_v2  ;;  %316 = vst [vmem:[%s272_s24 + $0x18] sm:$0xff] (%p5203_p5), %v315_v3 }
  0x1c PF: > { %331 = sbr.rel (!%p5203_p5) target bundleno = 36 (0x24), region = 78  ;;  %s333_s25 = sand.u32 (%p5203_p5), 1, %s5098_s29  }
  0x1d   : > { %s4488_s26 = sshll.u32 (%p5203_p5), %s5102_s30, 4  ;;  %s4289_s10 = sshll.u32 (%p5203_p5), %s333_s25, 6 }
  0x1e   : > { %s338_s18 = scalar_lea.vmem (%p5203_p5), %s6343_s6, %s4488_s26  ;;  %s335_s19 = scalar_lea.vmem (%p5203_p5), [#allocation4], %s4289_s10 }
  0x1f   : > { %v351_v4 = vld [vmem:[%s338_s18] sm:$0xff] (%p5203_p5)  ;;  %v353_v5 = vld [vmem:[%s338_s18 + $0x8] sm:$0xff] (%p5203_p5) }
  0x20   : > { %v355_v6 = vld [vmem:[%s338_s18 + $0x20] sm:$0xff] (%p5203_p5)  ;;  %352 = vst [vmem:[%s335_s19] sm:$0xff] (%p5203_p5), %v351_v4  ;;  %354 = vst [vmem:[%s335_s19 + $0x8] sm:$0xff] (%p5203_p5), %v353_v5  ;;  %v357_v7 = vld [vmem:[%s338_s18 + $0x28] sm:$0xff] (%p5203_p5) }
  0x21   : > { %356 = vst [vmem:[%s335_s19 + $0x10] sm:$0xff] (%p5203_p5), %v355_v6  ;;  %v359_v8 = vld [vmem:[%s338_s18 + $0x40] sm:$0xff] (%p5203_p5)  ;;  %v361_v9 = vld [vmem:[%s338_s18 + $0x48] sm:$0xff] (%p5203_p5)  ;;  %358 = vst [vmem:[%s335_s19 + $0x18] sm:$0xff] (%p5203_p5), %v357_v7 }
  0x22   : > { %360 = vst [vmem:[%s335_s19 + $0x20] sm:$0xff] (%p5203_p5), %v359_v8  ;;  %362 = vst [vmem:[%s335_s19 + $0x28] sm:$0xff] (%p5203_p5), %v361_v9  ;;  %v363_v10 = vld [vmem:[%s338_s18 + $0x60] sm:$0xff] (%p5203_p5)  ;;  %v365_v11 = vld [vmem:[%s338_s18 + $0x68] sm:$0xff] (%p5203_p5) }
  0x23   : > { %364 = vst [vmem:[%s335_s19 + $0x30] sm:$0xff] %v363_v10  ;;  %366 = vst [vmem:[%s335_s19 + $0x38] sm:$0xff] %v365_v11 }
  0x24 PF: > { %p4292_p10 = scmp.ge.s32.totalorder %s5102_s30, 1  ;;  %p371_p11 = scmp.lt.s32.totalorder %s5102_s30, 3 }
  0x26   : > { %p372_p12 = pnand %p4292_p10, %p371_p11 }
  0x27   : > { %v479_v12 = vld [vmem:[%s6339_s2] sm:$0x11] (!%p372_p12)  ;;  %v488_v13 = vlaneseq (!%p372_p12)  ;;  %v2202_v14 = vld [vmem:[%s6339_s2] sm:$0x44] (!%p372_p12)  ;;  %s5246_s25 = sand.u32 (!%p372_p12), 1, %s5094_s28   ;;  %s6347_s12 = smov (!%p372_p12), 111  }
  0x28   : > { %375 = sbr.rel (%p372_p12) target bundleno = 1030 (0x406), region = 101  ;;  %v4304_v15 = vcombine.low (!%p372_p12), %v479_v12, %v479_v12  ;;  %v4305_v16 = vcombine.high (!%p372_p12), %v479_v12, %v479_v12  ;;  %v4399_v17 = vcombine.low (!%p372_p12), %v2202_v14, %v2202_v14  ;;  %v4400_v18 = vcombine.high (!%p372_p12), %v2202_v14, %v2202_v14  ;;  %v782_v19 = vld [vmem:[%s6339_s2] sm:$0x11] (!%p372_p12)  ;;  %s6346_s26 = sshll.u32 (!%p372_p12), %s5246_s25, 5  ;;  %v2567_v46 = vld [vmem:[%s6339_s2] sm:$0x88] (!%p372_p12) }
  0x29   : > { %v5243_v20 = vshrl.u32 (!%p372_p12), %v488_v13, 7  ;;  %v4323_v21 = vcombine.low (!%p372_p12), %v782_v19, %v782_v19  ;;  %v4324_v22 = vcombine.high (!%p372_p12), %v782_v19, %v782_v19  ;;  %s5257_s10 = scalar_lea.vmem (!%p372_p12), [#allocation3], %s6346_s26  ;;  %s6349_s13 = smov (!%p372_p12), 1   ;;  %vm505_vm0 = vcmask (!%p372_p12), 908288   ;;  %v1149_v8 = vld [vmem:[%s6339_s2] sm:$0x22] (!%p372_p12) }
  0x2a   : > { %v486_v23 = vpack.i.b16 (!%p372_p12), %v4304_v15, %v4304_v15  ;;  %v2209_v24 = vshrl.u32 (!%p372_p12), %v4399_v17, 16  ;;  %v2217_v25 = vshrl.u32 (!%p372_p12), %v4400_v18, 16  ;;  %v493_v27 = vpack.i.b16 (!%p372_p12), %v4305_v16, %v4305_v16  ;;  %s5106_s18 = smov (!%p372_p12), 112   ;;  %s4297_s19 = sshll.u32 (!%p372_p12), %s5185_s9, 1  ;;  %v5273_v43 = vld [vmem:[%s5257_s10 + $0x4] ss:$8 sps:$4 sm:$0xff] (!%p372_p12)  }
  0x2b   : > { %v5250_v26 = vsub.s32 (!%p372_p12), 0, %v5243_v20  ;;  %v5253_v28 = vsub.s32 (!%p372_p12), 2, %v5243_v20  ;;  %v797_v29 = vshrl.u32 (!%p372_p12), %v4324_v22, 16  ;;  %v789_v32 = vshrl.u32 (!%p372_p12), %v4323_v21, 16  ;;  %p434_p13 = scmp.lt.s32.totalorder (!%p372_p12), %s4297_s19, 3  ;;  %s5107_s20 = smov (!%p372_p12), 17  }
  0x2c   : > { %v2210_v30 = vpack.i.b16 (!%p372_p12), %v2209_v24, %v2209_v24  ;;  %v2218_v31 = vpack.i.b16 (!%p372_p12), %v2217_v25, %v2217_v25  ;;  %v5276_v44 = vld [vmem:[%s5257_s10] ss:$8 sps:$4 sm:$0xff] (!%p372_p12)   ;;  %v5288_v49 = vld [vmem:[%s5257_s10 + $0x10] ss:$8 sps:$4 sm:$0xff] (!%p372_p12)   ;;  %v5292_v51 = vld [vmem:[%s5257_s10 + $0x14] ss:$8 sps:$4 sm:$0xff] (!%p372_p12)   ;;  %v4419_v53 = vcombine.high (!%p372_p12), %v2567_v46, %v2567_v46  ;;  %v4418_v54 = vcombine.low (!%p372_p12), %v2567_v46, %v2567_v46 }
  0x2d   : > { %v491_v33 = vrot.slane (!%p372_p12), %v486_v23, %v5250_v26  ;;  %v498_v35 = vrot.slane (!%p372_p12), %v493_v27, %v5250_v26  ;;  %v798_v36 = vpack.i.b16 (!%p372_p12), %v797_v29, %v797_v29  ;;  %v790_v38 = vpack.i.b16 (!%p372_p12), %v789_v32, %v789_v32  ;;  %s5108_s26 = smov (!%p372_p12), 15   ;;  %s5109_s10 = smov (!%p372_p12), 127   ;;  %v1881_v25 = vld [vmem:[%s6339_s2] sm:$0x44] (!%p372_p12) }
  0x2e   : > { %v2215_v34 = vrot.slane (!%p372_p12), %v2210_v30, %v5253_v28  ;;  %v2223_v37 = vrot.slane (!%p372_p12), %v2218_v31, %v5253_v28  ;;  %v5306_v59 = vsub.s32 (!%p372_p12), 3, %v5243_v20  ;;  %v2581_v60 = vpack.i.b16 (!%p372_p12), %v4419_v53, %v4419_v53  ;;  %s5110_s21 = smov (!%p372_p12), 16   ;;  %s5111_s22 = smov (!%p372_p12), 113   ;;  %v4845_v53 = vld [vmem:[%s6337_s0 + $0x118] sm:$0xff] (!%p372_p12)  }
  0x2f   : > { %501 = vrot.lane.b32.xlu0 %v491_v33, %s6347_s12  ;;  %v803_v39 = vrot.slane %v798_v36, %v5250_v26  ;;  %v795_v40 = vrot.slane %v790_v38, %v5250_v26  ;;  %s6362_s19 = smov (!%p434_p13, %s4297_s19), 3  ;;  %v2574_v61 = vpack.i.b16 %v4418_v54, %v4418_v54  ;;  %vm1631_vm1 = vcmask 7168  }
  0x30   : > { %2226 = vrot.lane.b32.xlu1 %v2215_v34, %s6349_s13  ;;  %s4298_s15 = sshll.u32 %s6362_s19, 1  ;;  %v2586_v0 = vrot.slane %v2581_v60, %v5306_v59  ;;  %v4343_v11 = vcombine.high %v1149_v8, %v1149_v8  ;;  %v4342_v14 = vcombine.low %v1149_v8, %v1149_v8  ;;  %v5334_v17 = vsub.s32 1, %v5243_v20 }
  0x31   : > { %s437_s23 = scalar_lea.vmem %s6342_s5, %s4298_s15  ;;  %v2579_v1 = vrot.slane %v2574_v61, %v5306_v59  ;;  %vm810_vm2 = vcmask 916480   ;;  %v4381_v27 = vcombine.high %v1881_v25, %v1881_v25  ;;  %v4380_v29 = vcombine.low %v1881_v25, %v1881_v25  ;;  %v4840_v25 = vld [vmem:[%s6337_s0 + $0x8] sm:$0xff]   ;;  %s6355_s15 = smov 111  }
  0x32   : > { %v5295_v52 = vld.sshfl [vmem:[%s437_s23] sm:$0x33 pattern:$0x76325410]  ;;  %v1163_v18 = vpack.i.b16 %v4343_v11, %v4343_v11  ;;  %v1156_v21 = vpack.i.b16 %v4342_v14, %v4342_v14  ;;  %v5112_v30 = vmov 0   ;;  %vm630_vm3 = vcmask 1041408  }
  0x33   : > { %503 = vrot.lane.b32.xlu0 %v498_v35, %s6347_s12  ;;  %v5302_v57 = vcombine.high %v5295_v52, %v5295_v52  ;;  %2025 = vmatprep.mubr.bf16.mxu0 %v5112_v30  ;;  %v1895_v33 = vpack.i.b16 %v4381_v27, %v4381_v27  ;;  %v1888_v34 = vpack.i.b16 %v4380_v29, %v4380_v29  ;;  %vm605_vm4 = vcmask 293888   ;;  %v4839_v11 = vld [vmem:[%s6337_s0] sm:$0xff]   ;;  %s6354_s23 = smov 1  }
  0x34   : > { %2228 = vrot.lane.b32.xlu1 %v2223_v37, %s6349_s13  ;;  %v1168_v22 = vrot.slane %v1163_v18, %v5334_v17  ;;  %v1161_v24 = vrot.slane %v1156_v21, %v5334_v17  ;;  %669 = vmatprep.mubr.bf16.mxu1 %v5112_v30  ;;  %vm594_vm5 = vcmask 138240   ;;  %vm1264_vm6 = vcmask 121856  }
  0x35   : > { %4814 = vset.pattern.permute.xlu0 %v5112_v30  ;;  %4815 = vset.pattern.permute.xlu1 %v5112_v30  ;;  %v1900_v35 = vrot.slane %v1895_v33, %v5253_v28  ;;  %v1893_v36 = vrot.slane %v1888_v34, %v5253_v28  ;;  %vm1542_vm7 = vcmask 1039360   ;;  %v1514_v34 = vld [vmem:[%s6339_s2] sm:$0x22]  ;;  %vm1175_vm8 = vcmask 924672  }
  0x36   : > { %vm899_vm9 = vcmask 130048  }
  0x37   : > { %808 = vrot.lane.b32.xlu0 %v803_v39, %s5106_s18  ;;  %v5363_v39 = vmul.bf16 %v5273_v43, %v1900_v35  ;;  %v5375_v28 = vmul.bf16 %v5288_v49, %v1893_v36 }
  0x38   : > { %806 = vrot.lane.b32.xlu1 %v795_v40, %s5106_s18  ;;  %v5366_v40 = vmul.bf16 %v5276_v44, %v1893_v36 }
  0x39   : > { %1993 = vmatprep.subr.bf16.mxu0 %v5363_v39 }
  0x3a   : > { %1994 = vmatpush1.bf16.msra.mxu0 %v5366_v40 }
  0xa1   : > { %v502_v41 = vpop.permute.xlu0 %501 }
  0xa2   : > { %v510_v42 = vmul.bf16 0, %v502_v41  ;;  %v2227_v58 = vpop.permute.xlu1 %2226 }
  0xa3   : > { %v2234_v3 = vmul.bf16 %v5276_v44, %v2227_v58  ;;  %v2237_v9 = vmul.bf16 %v5288_v49, %v2227_v58  ;;  %v2239_v10 = vmul.bf16 %v5295_v52, %v2227_v58 }
  0xa4   : > { %580 = vrot.lane.b32.xlu0 %v510_v42, %s5107_s20  ;;  %v5380_v42 = vmul.bf16 %v1900_v35, %v5302_v57 }
  0xa5   : > { %v504_v45 = vpop.permute.xlu0 %503 }
  0xa6   : > { %v506_v47 = vsel %vm505_vm0, %v502_v41, %v504_v45  ;;  %v512_v48 = vmul.bf16 %v5273_v43, %v504_v45  ;;  %v514_v56 = vmul.bf16 %v5292_v51, %v504_v45  ;;  %v516_v63 = vmul.bf16 %v504_v45, %v5302_v57  ;;  %v2229_v2 = vpop.permute.xlu1 %2228 }
  0xa7   : > { %v511_v50 = vmul.bf16 %v5276_v44, %v506_v47  ;;  %v513_v55 = vmul.bf16 %v5288_v49, %v506_v47  ;;  %v515_v62 = vmul.bf16 %v5295_v52, %v506_v47  ;;  %v2230_v4 = vsel %vm1631_vm1, %v2227_v58, %v2229_v2  ;;  %v4838_v47 = vld [vmem:[%s6337_s0 + $0x100] sm:$0xff]  }
  0xa8   : > { %584 = vrot.lane.b32.xlu1 %v512_v48, %s5107_s20  ;;  %v2236_v5 = vmul.bf16 0, %v2229_v2  ;;  %v2235_v6 = vmul.bf16 %v5273_v43, %v2230_v4  ;;  %v2238_v7 = vmul.bf16 %v5292_v51, %v2230_v4  ;;  %v2240_v13 = vmul.bf16 %v2230_v4, %v5302_v57  ;;  %v4841_v48 = vld [vmem:[%s6337_s0 + $0x108] sm:$0xff]  }
  0xa9   : > { %582 = vrot.lane.b32.xlu0 %v511_v50, %s5107_s20  ;;  %v809_v16 = vpop.permute.xlu0 %808  ;;  %v5369_v41 = vmul.bf16 %v5292_v51, %v1900_v35  ;;  %v1905_v45 = vmul.bf16 %v5295_v52, %v1893_v36  ;;  %v4843_v50 = vld [vmem:[%s6337_s0 + $0x110] sm:$0xff]  }
  0xaa   : > { %v807_v12 = vpop.permute.xlu1 %806  ;;  %v817_v19 = vmul.bf16 %v5273_v43, %v809_v16  ;;  %v819_v32 = vmul.bf16 %v5292_v51, %v809_v16  ;;  %v821_v38 = vmul.bf16 %v809_v16, %v5302_v57 }
  0xab   : > { %v815_v15 = vmul.bf16 0, %v807_v12  ;;  %v811_v23 = vsel %vm810_vm2, %v807_v12, %v809_v16  ;;  %1995 = vmatprep.subr.bf16.mxu0 %v5369_v41  ;;  %v5387_v46 = vsel %vm630_vm3, %v1905_v45, 0  ;;  %v4361_v45 = vcombine.low %v1514_v34, %v1514_v34 }
  0xac   : > { %586 = vrot.lane.b32.xlu1 %v513_v55, %s5107_s20  ;;  %v816_v20 = vmul.bf16 %v5276_v44, %v811_v23  ;;  %v818_v31 = vmul.bf16 %v5288_v49, %v811_v23  ;;  %v820_v37 = vmul.bf16 %v5295_v52, %v811_v23  ;;  %1996 = vmatpush1.bf16.msra.mxu0 %v5375_v28 }
  0xad   : > { %588 = vrot.lane.b32.xlu0 %v514_v56, %s5107_s20  ;;  %4390 = vmatprep.subr.msk.bf16.mxu0 %vm630_vm3, %v5380_v42  ;;  %v2930_v56 = vld [vmem:[%s6339_s2] sm:$0x88] }
  0xb0   : > { %590 = vrot.lane.b32.xlu1 %v515_v62, %s5107_s20  ;;  %1998 = vmatpush1.bf16.msra.mxu0 %v5387_v46  ;;  %v4437_v62 = vcombine.low %v2930_v56, %v2930_v56 }
  0xb1   : > { %592 = vrot.lane.b32.xlu0 %v516_v63, %s5107_s20 }
  0xb3   : > { %4391 = vmatmul.mubr.msk.bf16.vlgmr.msra.gmra.mrb[0].mxu0 %vm605_vm4, %v4838_v47 }
  0xb4   : > { %2591 = vrot.lane.b32.xlu1 %v2586_v0, %s5108_s26  ;;  %2035 = vmatprep.mubr.bf16.mxu0 %v5112_v30 }
  0xb5   : > { %2589 = vrot.lane.b32.xlu0 %v2579_v1, %s5108_s26 }
  0xb8   : > { %2304 = vrot.lane.b32.xlu1 %v2234_v3, %s5109_s10  ;;  %v2937_v3 = vshrl.u32 %v4437_v62, 16 }
  0xb9   : > { %2308 = vrot.lane.b32.xlu0 %v2236_v5, %s5109_s10 }
  0xbb   : > { %4392 = vmatmul.mubr.msk.bf16.gmra.mrb[4].mxu0 %vm605_vm4, %v4841_v48 }
  0xbc   : > { %2306 = vrot.lane.b32.xlu1 %v2235_v6, %s5109_s10  ;;  %2045 = vmatprep.mubr.bf16.mxu0 %v5112_v30 }
  0xbd   : > { %2312 = vrot.lane.b32.xlu0 %v2238_v7, %s5109_s10  ;;  %v4438_v7 = vcombine.high %v2930_v56, %v2930_v56  ;;  %v1521_v56 = vshrl.u32 %v4361_v45, 16  ;;  %v4866_v45 = vld [vmem:[%s6337_s0 + $0x168] sm:$0xff]  }
  0xc0   : > { %2310 = vrot.lane.b32.xlu1 %v2237_v9, %s5109_s10 }
  0xc1   : > { %2314 = vrot.lane.b32.xlu0 %v2239_v10, %s5109_s10  ;;  %v2938_v10 = vpack.i.b16 %v2937_v3, %v2937_v3 }
  0xc3   : > { %4393 = vmatmul.mubr.msk.bf16.gmra.mrb[8].mxu0 %vm605_vm4, %v4843_v50  ;;  %v4842_v50 = vld [vmem:[%s6337_s0 + $0x10] sm:$0xff]  }
  0xc4   : > { %2316 = vrot.lane.b32.xlu1 %v2240_v13, %s5109_s10  ;;  %2055 = vmatprep.mubr.bf16.mxu0 %v5112_v30 }
  0xc5   : > { %885 = vrot.lane.b32.xlu0 %v815_v15, %s5110_s21  ;;  %v2945_v15 = vshrl.u32 %v4438_v7, 16 }
  0xc7   : > { %v2946_v23 = vpack.i.b16 %v2945_v15, %v2945_v15 }
  0xc8   : > { %889 = vrot.lane.b32.xlu1 %v817_v19, %s5110_s21  ;;  %v2943_v19 = vrot.slane %v2938_v10, %v5306_v59 }
  0xc9   : > { %1173 = vrot.lane.b32.xlu0 %v1168_v22, %s5111_s22 }
  0xcb   : > { %4394 = vmatmul.mubr.msk.bf16.gmra.mrb[12].mxu0 %vm605_vm4, %v4845_v53 }
  0xcc   : > { %1171 = vrot.lane.b32.xlu1 %v1161_v24, %s5111_s22  ;;  %2390 = vmatprep.mubr.bf16.mxu0 %v5112_v30 }
  0xcd   : > { %887 = vrot.lane.b32.xlu0 %v816_v20, %s5110_s21 }
  0xd0   : > { %891 = vrot.lane.b32.xlu1 %v818_v31, %s5110_s21 }
  0xd1   : > { %893 = vrot.lane.b32.xlu0 %v819_v32, %s5110_s21  ;;  %v2951_v32 = vrot.slane %v2946_v23, %v5306_v59 }
  0xd4   : > { %895 = vrot.lane.b32.xlu1 %v820_v37, %s5110_s21 }
  0xd5   : > { %897 = vrot.lane.b32.xlu0 %v821_v38, %s5110_s21 }
 0x116   : > { %v581_v54 = vpop.permute.xlu0 %580 }
 0x11a   : > { %v585_v55 = vpop.permute.xlu1 %584 }
 0x11b   : > { %v583_v58 = vpop.permute.xlu0 %582 }
 0x11c   : > { %v596_v60 = vsel %vm594_vm5, %v583_v58, %v585_v55  ;;  %v595_v61 = vsel %vm594_vm5, %v581_v54, %v583_v58 }
 0x11d   : > { %637 = vmatprep.subr.bf16.mxu1 %v596_v60  ;;  %v4847_v60 = vld [vmem:[%s6337_s0 + $0x140] sm:$0xff]  }
 0x11e   : > { %v587_v63 = vpop.permute.xlu1 %586  ;;  %638 = vmatpush1.bf16.msra.mxu1 %v595_v61 }
 0x11f   : > { %v589_v0 = vpop.permute.xlu0 %588  ;;  %v597_v2 = vsel %vm594_vm5, %v581_v54, %v587_v63 }
 0x120   : > { %v598_v1 = vsel %vm594_vm5, %v587_v63, %v589_v0  ;;  %v4362_v63 = vcombine.high %v1514_v34, %v1514_v34  ;;  %v4860_v34 = vld [vmem:[%s6337_s0 + $0x150] sm:$0xff]  }
 0x121   : > { %639 = vmatprep.subr.bf16.mxu1 %v598_v1  ;;  %v1522_v1 = vpack.i.b16 %v1521_v56, %v1521_v56  ;;  %v4870_v56 = vld [vmem:[%s6337_s0 + $0x178] sm:$0xff]  }
 0x122   : > { %v591_v4 = vpop.permute.xlu1 %590  ;;  %640 = vmatpush1.bf16.msra.mxu1 %v597_v2 }
 0x123   : > { %v599_v5 = vsel %vm594_vm5, %v581_v54, %v591_v4  ;;  %v593_v6 = vpop.permute.xlu0 %592 }
 0x124   : > { %v600_v8 = vsel %vm594_vm5, %v591_v4, %v593_v6  ;;  %v632_v9 = vsel %vm630_vm3, %v599_v5, 0  ;;  %v1529_v4 = vshrl.u32 %v4362_v63, 16  ;;  %v1527_v6 = vrot.slane %v1522_v1, %v5334_v17 }
 0x125   : > { %4314 = vmatprep.subr.msk.bf16.mxu1 %vm630_vm3, %v600_v8  ;;  %v4844_v8 = vld [vmem:[%s6337_s0 + $0x18] sm:$0xff]  }
 0x126   : > { %v2592_v12 = vpop.permute.xlu1 %2591  ;;  %642 = vmatpush1.bf16.msra.mxu1 %v632_v9 }
 0x127   : > { %v2599_v13 = vmul.bf16 0, %v2592_v12  ;;  %v2590_v14 = vpop.permute.xlu0 %2589 }
 0x128   : > { %v2593_v16 = vsel %vm1264_vm6, %v2590_v14, %v2592_v12  ;;  %v2597_v24 = vmul.bf16 %v5276_v44, %v2590_v14  ;;  %v2602_v59 = vmul.bf16 %v5295_v52, %v2590_v14  ;;  %v2600_v47 = vmul.bf16 %v5288_v49, %v2590_v14 }
 0x129   : > { %2671 = vrot.lane.b32.xlu0 %v2599_v13, %s5111_s22  ;;  %v2598_v18 = vmul.bf16 %v5273_v43, %v2593_v16  ;;  %4315 = vmatmul.mubr.msk.bf16.vlgmr.msra.gmra.mrb[0].mxu1 %vm605_vm4, %v4839_v11  ;;  %v2601_v29 = vmul.bf16 %v5292_v51, %v2593_v16  ;;  %v2603_v61 = vmul.bf16 %v2593_v16, %v5302_v57 }
 0x12a   : > { %v2305_v21 = vpop.permute.xlu1 %2304  ;;  %679 = vmatprep.mubr.bf16.mxu1 %v5112_v30  ;;  %v1530_v13 = vpack.i.b16 %v1529_v4, %v1529_v4 }
 0x12b   : > { %2669 = vrot.lane.b32.xlu1 %v2598_v18, %s5111_s22  ;;  %v2309_v22 = vpop.permute.xlu0 %2308 }
 0x12d   : > { %2954 = vrot.lane.b32.xlu0 %v2943_v19, %s5110_s21 }
 0x12e   : > { %v2307_v20 = vpop.permute.xlu1 %2306 }
 0x12f   : > { %v2318_v27 = vsel %vm1542_vm7, %v2305_v21, %v2307_v20  ;;  %2667 = vrot.lane.b32.xlu1 %v2597_v24, %s5111_s22  ;;  %v2313_v31 = vpop.permute.xlu0 %2312  ;;  %v2319_v33 = vsel %vm1542_vm7, %v2307_v20, %v2309_v22  ;;  %v1535_v21 = vrot.slane %v1530_v13, %v5334_v17  ;;  %v4858_v17 = vld [vmem:[%s6337_s0 + $0x148] sm:$0xff]  }
 0x130   : > { %2358 = vmatprep.subr.bf16.mxu0 %v2319_v33  ;;  %v2321_v35 = vsel %vm1542_vm7, %v2313_v31, %v2309_v22  ;;  %v4849_v33 = vld [vmem:[%s6337_s0 + $0x28] sm:$0xff]  }
 0x131   : > { %2675 = vrot.lane.b32.xlu0 %v2601_v29, %s5111_s22  ;;  %2359 = vmatpush1.bf16.msra.mxu0 %v2318_v27 }
 0x132   : > { %v2311_v36 = vpop.permute.xlu1 %2310  ;;  %2360 = vmatprep.subr.bf16.mxu0 %v2321_v35  ;;  %4316 = vmatmul.mubr.msk.bf16.gmra.mrb[4].mxu1 %vm605_vm4, %v4840_v25  ;;  %v4846_v25 = vld [vmem:[%s6337_s0 + $0x20] sm:$0xff]   ;;  %v4851_v35 = vld [vmem:[%s6337_s0 + $0x30] sm:$0xff]  }
 0x133   : > { %v2320_v37 = vsel %vm1542_vm7, %v2311_v36, %v2313_v31  ;;  %2956 = vrot.lane.b32.xlu1 %v2951_v32, %s5110_s21  ;;  %v2315_v38 = vpop.permute.xlu0 %2314  ;;  %689 = vmatprep.mubr.bf16.mxu1 %v5112_v30  ;;  %v4862_v36 = vld [vmem:[%s6337_s0 + $0x158] sm:$0xff]  }
 0x135   : > { %2677 = vrot.lane.b32.xlu0 %v2602_v59, %s5111_s22  ;;  %2361 = vmatpush1.bf16.msra.mxu0 %v2320_v37  ;;  %v4852_v37 = vld [vmem:[%s6337_s0 + $0x38] sm:$0xff]   ;;  %v4864_v59 = vld [vmem:[%s6337_s0 + $0x160] sm:$0xff]  }
 0x136   : > { %v2317_v48 = vpop.permute.xlu1 %2316 }
 0x137   : > { %v2323_v53 = vsel %vm1542_vm7, %v2317_v48, %v2309_v22  ;;  %v2322_v54 = vsel %vm1542_vm7, %v2315_v38, %v2317_v48  ;;  %2673 = vrot.lane.b32.xlu1 %v2600_v47, %s5111_s22  ;;  %v886_v55 = vpop.permute.xlu0 %885  ;;  %v4853_v38 = vld [vmem:[%s6337_s0 + $0x40] sm:$0xff]   ;;  %v4854_v47 = vld [vmem:[%s6337_s0 + $0x48] sm:$0xff]   ;;  %v4868_v48 = vld [vmem:[%s6337_s0 + $0x170] sm:$0xff]  }
 0x138   : > { %v2353_v58 = vsel %vm630_vm3, %v2322_v54, 0  ;;  %4409 = vmatprep.subr.msk.bf16.mxu0 %vm630_vm3, %v2323_v53  ;;  %v4856_v53 = vld [vmem:[%s6337_s0 + $0x58] sm:$0xff]   ;;  %v4857_v54 = vld [vmem:[%s6337_s0 + $0x60] sm:$0xff]  }
 0x139   : > { %2363 = vmatpush1.bf16.msra.mxu0 %v2353_v58  ;;  %v3295_v58 = vld [vmem:[%s6339_s2 + $0x8] sm:$0x11] }
 0x13a   : > { %v890_v62 = vpop.permute.xlu1 %889  ;;  %4317 = vmatmul.mubr.msk.bf16.gmra.mrb[8].mxu1 %vm605_vm4, %v4842_v50  ;;  %v4855_v50 = vld [vmem:[%s6337_s0 + $0x50] sm:$0xff]  }
 0x13b   : > { %2679 = vrot.lane.b32.xlu1 %v2603_v61, %s5111_s22  ;;  %v1174_v0 = vpop.permute.xlu0 %1173  ;;  %699 = vmatprep.mubr.bf16.mxu1 %v5112_v30  ;;  %v4457_v61 = vcombine.high %v3295_v58, %v3295_v58  ;;  %s4294_s22 = sshll.u32 %s5246_s25, 6 }
 0x13c   : > { %v1182_v2 = vmul.bf16 %v5273_v43, %v1174_v0  ;;  %4410 = vmatmul.mubr.msk.bf16.vlgmr.msra.gmra.mrb[0].mxu0 %vm605_vm4, %v4847_v60  ;;  %v1184_v31 = vmul.bf16 %v5292_v51, %v1174_v0  ;;  %v1186_v32 = vmul.bf16 %v1174_v0, %v5302_v57  ;;  %v4861_v60 = vld [vmem:[%s6337_s0 + $0x70] sm:$0xff]  }
 0x13d   : > { %2400 = vmatprep.mubr.bf16.mxu0 %v5112_v30  ;;  %v3309_v1 = vpack.i.b16 %v4457_v61, %v4457_v61 }
 0x13e   : > { %v1172_v3 = vpop.permute.xlu1 %1171 }
 0x13f   : > { %v1176_v5 = vsel %vm1175_vm8, %v1172_v3, %v1174_v0  ;;  %1254 = vrot.lane.b32.xlu1 %v1182_v2, %s5108_s26  ;;  %v888_v7 = vpop.permute.xlu0 %887  ;;  %v1180_v12 = vmul.bf16 0, %v1172_v3  ;;  %v4863_v3 = vld [vmem:[%s6337_s0 + $0x78] sm:$0xff]  }
 0x140   : > { %v1181_v9 = vmul.bf16 %v5276_v44, %v1176_v5  ;;  %v900_v10 = vsel %vm899_vm9, %v886_v55, %v888_v7  ;;  %v901_v11 = vsel %vm899_vm9, %v888_v7, %v890_v62  ;;  %v1183_v18 = vmul.bf16 %v5288_v49, %v1176_v5 }
 0x141   : > { %940 = vmatprep.subr.bf16.mxu1 %v901_v11  ;;  %v1185_v20 = vmul.bf16 %v5295_v52, %v1176_v5  ;;  %v4456_v5 = vcombine.low %v3295_v58, %v3295_v58 }
 0x142   : > { %1252 = vrot.lane.b32.xlu0 %v1181_v9, %s5108_s26  ;;  %941 = vmatpush1.bf16.msra.mxu1 %v900_v10  ;;  %v892_v14 = vpop.permute.xlu1 %891 }
 0x143   : > { %1538 = vrot.lane.b32.xlu1 %v1527_v6, %s5109_s10  ;;  %v902_v15 = vsel %vm899_vm9, %v886_v55, %v892_v14  ;;  %v894_v16 = vpop.permute.xlu0 %893  ;;  %4318 = vmatmul.mubr.msk.bf16.gmra.mrb[12].mxu1 %vm605_vm4, %v4844_v8  ;;  %v3314_v8 = vrot.slane %v3309_v1, %v5250_v26  ;;  %v3302_v11 = vpack.i.b16 %v4456_v5, %v4456_v5  ;;  %v4879_v5 = vld [vmem:[%s6337_s0 + $0x198] sm:$0xff]  }
 0x144   : > { %v903_v19 = vsel %vm899_vm9, %v892_v14, %v894_v16  ;;  %709 = vmatprep.mubr.bf16.mxu1 %v5112_v30  ;;  %4411 = vmatmul.mubr.msk.bf16.gmra.mrb[4].mxu0 %vm605_vm4, %v4858_v17 }
 0x145   : > { %942 = vmatprep.subr.bf16.mxu1 %v903_v19  ;;  %2410 = vmatprep.mubr.bf16.mxu0 %v5112_v30  ;;  %v3307_v16 = vrot.slane %v3302_v11, %v5250_v26  ;;  %v4885_v11 = vld [vmem:[%s6337_s0 + $0x1b0] sm:$0xff]  }
 0x146   : > { %1250 = vrot.lane.b32.xlu0 %v1180_v12, %s5108_s26  ;;  %943 = vmatpush1.bf16.msra.mxu1 %v902_v15  ;;  %v896_v22 = vpop.permute.xlu1 %895 }
 0x147   : > { %v904_v23 = vsel %vm899_vm9, %v886_v55, %v896_v22  ;;  %v898_v24 = vpop.permute.xlu0 %897  ;;  %1256 = vrot.lane.b32.xlu1 %v1183_v18, %s5108_s26  ;;  %v4859_v55 = vld [vmem:[%s6337_s0 + $0x68] sm:$0xff]  }
 0x148   : > { %v935_v27 = vsel %vm630_vm3, %v904_v23, 0  ;;  %v905_v29 = vsel %vm899_vm9, %v896_v22, %v898_v24 }
 0x149   : > { %4333 = vmatprep.subr.msk.bf16.mxu1 %vm630_vm3, %v905_v29 }
 0x14a   : > { %1540 = vrot.lane.b32.xlu0 %v1535_v21, %s5109_s10  ;;  %945 = vmatpush1.bf16.msra.mxu1 %v935_v27  ;;  %v4872_v27 = vld [vmem:[%s6337_s0 + $0x180] sm:$0xff]  }
 0x14b   : > { %1260 = vrot.lane.b32.xlu1 %v1185_v20, %s5108_s26  ;;  %4319 = vmatmul.mubr.msk.bf16.gmra.mrb[16].mxu1 %vm605_vm4, %v4846_v25 }
 0x14c   : > { %719 = vmatprep.mubr.bf16.mxu1 %v5112_v30  ;;  %4412 = vmatmul.mubr.msk.bf16.gmra.mrb[8].mxu0 %vm605_vm4, %v4860_v34 }
 0x14d   : > { %2420 = vmatprep.mubr.bf16.mxu0 %v5112_v30 }
 0x14e   : > { %1258 = vrot.lane.b32.xlu0 %v1184_v31, %s5108_s26 }
 0x152   : > { %1262 = vrot.lane.b32.xlu0 %v1186_v32, %s5108_s26 }
 0x153   : > { %4320 = vmatmul.mubr.msk.bf16.gmra.mrb[20].mxu1 %vm605_vm4, %v4849_v33 }
 0x154   : > { %729 = vmatprep.mubr.bf16.mxu1 %v5112_v30  ;;  %4413 = vmatmul.mubr.msk.bf16.gmra.mrb[12].mxu0 %vm605_vm4, %v4862_v36  ;;  %v4875_v36 = vld [vmem:[%s6337_s0 + $0x188] sm:$0xff]  }
 0x155   : > { %2430 = vmatprep.mubr.bf16.mxu0 %v5112_v30 }
 0x15b   : > { %4321 = vmatmul.mubr.msk.bf16.gmra.mrb[24].mxu1 %vm605_vm4, %v4851_v35 }
 0x15c   : > { %739 = vmatprep.mubr.bf16.mxu1 %v5112_v30  ;;  %4414 = vmatmul.mubr.msk.bf16.gmra.mrb[16].mxu0 %vm605_vm4, %v4864_v59 }
 0x15d   : > { %2440 = vmatprep.mubr.bf16.mxu0 %v5112_v30 }
 0x163   : > { %4322 = vmatmul.mubr.msk.bf16.gmra.mrb[28].mxu1 %vm605_vm4, %v4852_v37 }
 0x164   : > { %972 = vmatprep.mubr.bf16.mxu1 %v5112_v30  ;;  %4415 = vmatmul.mubr.msk.bf16.gmra.mrb[20].mxu0 %vm605_vm4, %v4866_v45 }
 0x165   : > { %2450 = vmatprep.mubr.bf16.mxu0 %v5112_v30 }
 0x16b   : > { %4334 = vmatmul.mubr.msk.bf16.vlgmr.msra.gmra.mrb[0].mxu1 %vm605_vm4, %v4853_v38 }
 0x16c   : > { %982 = vmatprep.mubr.bf16.mxu1 %v5112_v30  ;;  %4416 = vmatmul.mubr.msk.bf16.gmra.mrb[24].mxu0 %vm605_vm4, %v4868_v48 }
 0x16d   : > { %2460 = vmatprep.mubr.bf16.mxu0 %v5112_v30 }
 0x173   : > { %4335 = vmatmul.mubr.msk.bf16.gmra.mrb[4].mxu1 %vm605_vm4, %v4854_v47 }
 0x174   : > { %992 = vmatprep.mubr.bf16.mxu1 %v5112_v30  ;;  %4417 = vmatmul.mubr.msk.bf16.gmra.mrb[28].mxu0 %vm605_vm4, %v4870_v56 }
 0x175   : > { %2753 = vmatprep.mubr.bf16.mxu0 %v5112_v30 }
 0x17b   : > { %4336 = vmatmul.mubr.msk.bf16.gmra.mrb[8].mxu1 %vm605_vm4, %v4855_v50 }
 0x17c   : > { %1002 = vmatprep.mubr.bf16.mxu1 %v5112_v30 }
 0x183   : > { %4337 = vmatmul.mubr.msk.bf16.gmra.mrb[12].mxu1 %vm605_vm4, %v4856_v53 }
 0x184   : > { %1012 = vmatprep.mubr.bf16.mxu1 %v5112_v30 }
 0x18b   : > { %4338 = vmatmul.mubr.msk.bf16.gmra.mrb[16].mxu1 %vm605_vm4, %v4857_v54 }
 0x18c   : > { %1022 = vmatprep.mubr.bf16.mxu1 %v5112_v30 }
 0x193   : > { %4339 = vmatmul.mubr.msk.bf16.gmra.mrb[20].mxu1 %vm605_vm4, %v4859_v55 }
 0x194   : > { %1032 = vmatprep.mubr.bf16.mxu1 %v5112_v30 }
 0x19b   : > { %v2672_v62 = vpop.permute.xlu0 %2671  ;;  %4340 = vmatmul.mubr.msk.bf16.gmra.mrb[24].mxu1 %vm605_vm4, %v4861_v60  ;;  %v4877_v60 = vld [vmem:[%s6337_s0 + $0x190] sm:$0xff]  }
 0x19c   : > { %1042 = vmatprep.mubr.bf16.mxu1 %v5112_v30 }
 0x19d   : > { %v2670_v63 = vpop.permute.xlu1 %2669 }
 0x19e   : > { %v2682_v0 = vsel %vm1175_vm8, %v2670_v63, %v2672_v62 }
 0x19f   : > { %2721 = vmatprep.subr.bf16.mxu0 %v2682_v0  ;;  %v2955_v2 = vpop.permute.xlu0 %2954 }
 0x1a0   : > { %v2962_v4 = vmul.bf16 %v5276_v44, %v2955_v2  ;;  %v2965_v21 = vmul.bf16 %v5288_v49, %v2955_v2  ;;  %v2967_v31 = vmul.bf16 %v5295_v52, %v2955_v2 }
 0x1a1   : > { %v2668_v6 = vpop.permute.xlu1 %2667 }
 0x1a2   : > { %v2681_v7 = vsel %vm1175_vm8, %v2668_v6, %v2670_v63  ;;  %3032 = vrot.lane.b32.xlu1 %v2962_v4, %s5106_s18  ;;  %v4865_v4 = vld [vmem:[%s6337_s0 + $0x80] sm:$0xff]   ;;  %v4867_v6 = vld [vmem:[%s6337_s0 + $0x88] sm:$0xff]  }
 0x1a3   : > { %2722 = vmatpush1.bf16.msra.mxu0 %v2681_v7  ;;  %v2676_v9 = vpop.permute.xlu0 %2675  ;;  %4341 = vmatmul.mubr.msk.bf16.gmra.mrb[28].mxu1 %vm605_vm4, %v4863_v3  ;;  %v4881_v7 = vld [vmem:[%s6337_s0 + $0x1a0] sm:$0xff]  }
 0x1a4   : > { %v2684_v10 = vsel %vm1175_vm8, %v2676_v9, %v2672_v62  ;;  %1337 = vmatprep.mubr.bf16.mxu1 %v5112_v30 }
 0x1a5   : > { %v2957_v12 = vpop.permute.xlu1 %2956  ;;  %2723 = vmatprep.subr.bf16.mxu0 %v2684_v10  ;;  %v4871_v10 = vld [vmem:[%s6337_s0 + $0x98] sm:$0xff]  }
 0x1a6   : > { %v2958_v13 = vsel %vm899_vm9, %v2955_v2, %v2957_v12  ;;  %v2964_v14 = vmul.bf16 0, %v2957_v12  ;;  %3319 = vrot.lane.b32.xlu1 %v3314_v8, %s5107_s20  ;;  %v4869_v8 = vld [vmem:[%s6337_s0 + $0x90] sm:$0xff]   ;;  %v4873_v12 = vld [vmem:[%s6337_s0 + $0xa0] sm:$0xff]  }
 0x1a7   : > { %v2963_v15 = vmul.bf16 %v5273_v43, %v2958_v13  ;;  %v2678_v22 = vpop.permute.xlu0 %2677  ;;  %v2966_v26 = vmul.bf16 %v5292_v51, %v2958_v13  ;;  %v2968_v29 = vmul.bf16 %v2958_v13, %v5302_v57  ;;  %v4887_v13 = vld [vmem:[%s6337_s0 + $0x1b8] sm:$0xff]  }
 0x1a8   : > { %3036 = vrot.lane.b32.xlu0 %v2964_v14, %s5106_s18  ;;  %v4874_v14 = vld [vmem:[%s6337_s0 + $0xa8] sm:$0xff]  }
 0x1a9   : > { %v2674_v18 = vpop.permute.xlu1 %2673 }
 0x1aa   : > { %v2683_v19 = vsel %vm1175_vm8, %v2674_v18, %v2676_v9  ;;  %3034 = vrot.lane.b32.xlu1 %v2963_v15, %s5106_s18  ;;  %v4883_v9 = vld [vmem:[%s6337_s0 + $0x1a8] sm:$0xff]   ;;  %v4876_v15 = vld [vmem:[%s6337_s0 + $0xb0] sm:$0xff]  }
 0x1ab   : > { %2724 = vmatpush1.bf16.msra.mxu0 %v2683_v19 }
 0x1ac   : > { %3317 = vrot.lane.b32.xlu0 %v3307_v16, %s5107_s20  ;;  %v4878_v16 = vld [vmem:[%s6337_s0 + $0xb8] sm:$0xff]   ;;  %s6017_s20 = scalar_lea.vmem [#allocation4], %s4294_s22 }
 0x1ad   : > { %v2680_v23 = vpop.permute.xlu1 %2679 }
 0x1ae   : > { %v2685_v24 = vsel %vm1175_vm8, %v2678_v22, %v2680_v23  ;;  %v2686_v20 = vsel %vm1175_vm8, %v2680_v23, %v2672_v62  ;;  %3038 = vrot.lane.b32.xlu1 %v2965_v21, %s5106_s18 }
 0x1af   : > { %v2716_v25 = vsel %vm630_vm3, %v2685_v24, 0  ;;  %4428 = vmatprep.subr.msk.bf16.mxu0 %vm630_vm3, %v2686_v20 }
 0x1b0   : > { %3040 = vrot.lane.b32.xlu0 %v2966_v26, %s5106_s18  ;;  %2726 = vmatpush1.bf16.msra.mxu0 %v2716_v25 }
 0x1b1   : > { %v1255_v17 = vpop.permute.xlu1 %1254 }
 0x1b2   : > { %3044 = vrot.lane.b32.xlu1 %v2968_v29, %s5106_s18 }
 0x1b3   : > { %4429 = vmatmul.mubr.msk.bf16.vlgmr.msra.gmra.mrb[0].mxu0 %vm605_vm4, %v4872_v27 }
 0x1b4   : > { %3042 = vrot.lane.b32.xlu0 %v2967_v31, %s5106_s18  ;;  %v1253_v32 = vpop.permute.xlu0 %1252  ;;  %2763 = vmatprep.mubr.bf16.mxu0 %v5112_v30  ;;  %s4494_s18 = sshll.u32 %s5185_s9, 8 }
 0x1b5   : > { %v1539_v33 = vpop.permute.xlu1 %1538  ;;  %v1266_v34 = vsel %vm1264_vm6, %v1253_v32, %v1255_v17  ;;  %s6239_s13 = scalar_lea.hbm %s6345_s8, %s4494_s18  ;;  %s4124_s18 = scalar_lea.sflag [#allocation8], %s5246_s25 }
 0x1b6   : > { %v1547_v35 = vmul.bf16 0, %v1539_v33  ;;  %1305 = vmatprep.subr.bf16.mxu1 %v1266_v34 }
 0x1b8   : > { %v1251_v37 = vpop.permute.xlu0 %1250  ;;  %1617 = vrot.lane.b32.xlu0 %v1547_v35, %s6354_s23 }
 0x1b9   : > { %v1265_v59 = vsel %vm1264_vm6, %v1251_v37, %v1253_v32  ;;  %v1257_v38 = vpop.permute.xlu1 %1256 }
 0x1ba   : > { %1306 = vmatpush1.bf16.msra.mxu1 %v1265_v59  ;;  %v1267_v56 = vsel %vm1264_vm6, %v1251_v37, %v1257_v38 }
 0x1bb   : > { %4430 = vmatmul.mubr.msk.bf16.gmra.mrb[4].mxu0 %vm605_vm4, %v4875_v36 }
 0x1bc   : > { %v1541_v45 = vpop.permute.xlu0 %1540  ;;  %2773 = vmatprep.mubr.bf16.mxu0 %v5112_v30 }
 0x1bd   : > { %v1543_v47 = vsel %vm1542_vm7, %v1539_v33, %v1541_v45  ;;  %v1549_v48 = vmul.bf16 %v5273_v43, %v1541_v45  ;;  %v1261_v53 = vpop.permute.xlu1 %1260  ;;  %v1551_v55 = vmul.bf16 %v5292_v51, %v1541_v45  ;;  %v1553_v0 = vmul.bf16 %v1541_v45, %v5302_v57 }
 0x1be   : > { %v1548_v50 = vmul.bf16 %v5276_v44, %v1543_v47  ;;  %v1550_v54 = vmul.bf16 %v5288_v49, %v1543_v47  ;;  %v1269_v62 = vsel %vm1264_vm6, %v1251_v37, %v1261_v53  ;;  %v1552_v63 = vmul.bf16 %v5295_v52, %v1543_v47 }
 0x1bf   : > { %1621 = vrot.lane.b32.xlu1 %v1549_v48, %s6354_s23  ;;  %v1300_v1 = vsel %vm630_vm3, %v1269_v62, 0 }
 0x1c0   : > { %1619 = vrot.lane.b32.xlu0 %v1548_v50, %s6354_s23  ;;  %v1259_v58 = vpop.permute.xlu0 %1258 }
 0x1c1   : > { %v1268_v61 = vsel %vm1264_vm6, %v1257_v38, %v1259_v58  ;;  %v4893_v58 = vld [vmem:[%s6337_s0 + $0x1d0] sm:$0xff]  }
 0x1c2   : > { %1307 = vmatprep.subr.bf16.mxu1 %v1268_v61 }
 0x1c3   : > { %1623 = vrot.lane.b32.xlu1 %v1550_v54, %s6354_s23  ;;  %1308 = vmatpush1.bf16.msra.mxu1 %v1267_v56 }
 0x1c4   : > { %1625 = vrot.lane.b32.xlu0 %v1551_v55, %s6354_s23  ;;  %v1263_v2 = vpop.permute.xlu0 %1262  ;;  %4431 = vmatmul.mubr.msk.bf16.gmra.mrb[8].mxu0 %vm605_vm4, %v4877_v60 }
 0x1c5   : > { %v1270_v3 = vsel %vm1264_vm6, %v1261_v53, %v1263_v2  ;;  %2783 = vmatprep.mubr.bf16.mxu0 %v5112_v30  ;;  %v4895_v2 = vld [vmem:[%s6337_s0 + $0x1d8] sm:$0xff]  }
 0x1c6   : > { %4352 = vmatprep.subr.msk.bf16.mxu1 %vm630_vm3, %v1270_v3  ;;  %v4882_v3 = vld [vmem:[%s6337_s0 + $0xc8] sm:$0xff]  }
 0x1c7   : > { %1627 = vrot.lane.b32.xlu1 %v1552_v63, %s6354_s23  ;;  %1310 = vmatpush1.bf16.msra.mxu1 %v1300_v1  ;;  %v4880_v1 = vld [vmem:[%s6337_s0 + $0xc0] sm:$0xff]  }
 0x1c8   : > { %1629 = vrot.lane.b32.xlu0 %v1553_v0, %s6354_s23 }
 0x1ca   : > { %4353 = vmatmul.mubr.msk.bf16.vlgmr.msra.gmra.mrb[0].mxu1 %vm605_vm4, %v4865_v4  ;;  %v3690_v4 = vld [vmem:[%s6338_s1] sm:$0xff] }
 0x1cb   : > { %1347 = vmatprep.mubr.bf16.mxu1 %v5112_v30 }
 0x1cc   : > { %4432 = vmatmul.mubr.msk.bf16.gmra.mrb[12].mxu0 %vm605_vm4, %v4879_v5  ;;  %v3691_v5 = vld [vmem:[%s6338_s1 + $0x8] sm:$0xff] }
 0x1cd   : > { %2793 = vmatprep.mubr.bf16.mxu0 %v5112_v30 }
 0x1d2   : > { %4354 = vmatmul.mubr.msk.bf16.gmra.mrb[4].mxu1 %vm605_vm4, %v4867_v6  ;;  %v4903_v6 = vld [vmem:[%s6337_s0 + $0x1f8] sm:$0xff]  }
 0x1d3   : > { %1357 = vmatprep.mubr.bf16.mxu1 %v5112_v30 }
 0x1d4   : > { %4433 = vmatmul.mubr.msk.bf16.gmra.mrb[16].mxu0 %vm605_vm4, %v4881_v7  ;;  %v3692_v7 = vld [vmem:[%s6338_s1 + $0x10] sm:$0xff] }
 0x1d5   : > { %2803 = vmatprep.mubr.bf16.mxu0 %v5112_v30 }
 0x1da   : > { %4355 = vmatmul.mubr.msk.bf16.gmra.mrb[8].mxu1 %vm605_vm4, %v4869_v8  ;;  %v3693_v8 = vld [vmem:[%s6338_s1 + $0x18] sm:$0xff] }
 0x1db   : > { %1367 = vmatprep.mubr.bf16.mxu1 %v5112_v30 }
 0x1dc   : > { %4434 = vmatmul.mubr.msk.bf16.gmra.mrb[20].mxu0 %vm605_vm4, %v4883_v9  ;;  %v4890_v9 = vld [vmem:[%s6337_s0 + $0xe8] sm:$0xff]  }
 0x1dd   : > { %2813 = vmatprep.mubr.bf16.mxu0 %v5112_v30 }
 0x1e2   : > { %4356 = vmatmul.mubr.msk.bf16.gmra.mrb[12].mxu1 %vm605_vm4, %v4871_v10  ;;  %v3694_v10 = vld [vmem:[%s6338_s1 + $0x20] sm:$0xff] }
 0x1e3   : > { %1377 = vmatprep.mubr.bf16.mxu1 %v5112_v30 }
 0x1e4   : > { %4435 = vmatmul.mubr.msk.bf16.gmra.mrb[24].mxu0 %vm605_vm4, %v4885_v11  ;;  %v3695_v11 = vld [vmem:[%s6338_s1 + $0x28] sm:$0xff] }
 0x1e5   : > { %2823 = vmatprep.mubr.bf16.mxu0 %v5112_v30 }
 0x1ea   : > { %4357 = vmatmul.mubr.msk.bf16.gmra.mrb[16].mxu1 %vm605_vm4, %v4873_v12  ;;  %v4892_v12 = vld [vmem:[%s6337_s0 + $0xf0] sm:$0xff]  }
 0x1eb   : > { %1387 = vmatprep.mubr.bf16.mxu1 %v5112_v30 }
 0x1ec   : > { %4436 = vmatmul.mubr.msk.bf16.gmra.mrb[28].mxu0 %vm605_vm4, %v4887_v13  ;;  %v4894_v13 = vld [vmem:[%s6337_s0 + $0xf8] sm:$0xff]  }
 0x1ed   : > { %3118 = vmatprep.mubr.bf16.mxu0 %v5112_v30 }
 0x1f2   : > { %4358 = vmatmul.mubr.msk.bf16.gmra.mrb[20].mxu1 %vm605_vm4, %v4874_v14  ;;  %v3696_v14 = vld [vmem:[%s6338_s1 + $0x30] sm:$0xff] }
 0x1f3   : > { %1397 = vmatprep.mubr.bf16.mxu1 %v5112_v30 }
 0x1fa   : > { %4359 = vmatmul.mubr.msk.bf16.gmra.mrb[24].mxu1 %vm605_vm4, %v4876_v15  ;;  %v3697_v15 = vld [vmem:[%s6338_s1 + $0x38] sm:$0xff] }
 0x1fb   : > { %1407 = vmatprep.mubr.bf16.mxu1 %v5112_v30 }
 0x202   : > { %4360 = vmatmul.mubr.msk.bf16.gmra.mrb[28].mxu1 %vm605_vm4, %v4878_v16  ;;  %v4896_v16 = vld [vmem:[%s6337_s0 + $0x120] sm:$0xff]  }
 0x203   : > { %1704 = vmatprep.mubr.bf16.mxu1 %v5112_v30 }
 0x214   : > { %v3033_v18 = vpop.permute.xlu1 %3032 }
 0x218   : > { %v3320_v19 = vpop.permute.xlu1 %3319 }
 0x219   : > { %v3327_v21 = vmul.bf16 0, %v3320_v19 }
 0x21a   : > { %v3037_v22 = vpop.permute.xlu0 %3036 }
 0x21b   : > { %3399 = vrot.lane.b32.xlu0 %v3327_v21, %s6355_s15  ;;  %v3700_v21 = vld [vmem:[%s6338_s1 + $0x50] sm:$0xff] }
 0x21c   : > { %v3035_v23 = vpop.permute.xlu1 %3034 }
 0x21d   : > { %v3046_v24 = vsel %vm810_vm2, %v3033_v18, %v3035_v23  ;;  %v3047_v20 = vsel %vm810_vm2, %v3035_v23, %v3037_v22  ;;  %v3698_v18 = vld [vmem:[%s6338_s1 + $0x40] sm:$0xff]  ;;  %v4898_v23 = vld [vmem:[%s6337_s0 + $0x128] sm:$0xff]  }
 0x21e   : > { %3086 = vmatprep.subr.bf16.mxu0 %v3047_v20  ;;  %v3318_v26 = vpop.permute.xlu0 %3317  ;;  %v3703_v20 = vld [vmem:[%s6338_s1 + $0x68] sm:$0xff] }
 0x21f   : > { %v3321_v25 = vsel %vm594_vm5, %v3318_v26, %v3320_v19  ;;  %3087 = vmatpush1.bf16.msra.mxu0 %v3046_v24  ;;  %v3330_v35 = vmul.bf16 %v5295_v52, %v3318_v26  ;;  %v3325_v36 = vmul.bf16 %v5276_v44, %v3318_v26  ;;  %v3328_v38 = vmul.bf16 %v5288_v49, %v3318_v26  ;;  %v4889_v44 = vld [vmem:[%s6337_s0 + $0x1c0] sm:$0xff]   ;;  %v4891_v49 = vld [vmem:[%s6337_s0 + $0x1c8] sm:$0xff]   ;;  %v3704_v26 = vld [vmem:[%s6338_s1 + $0x70] sm:$0xff] }
 0x220   : > { %v3039_v27 = vpop.permute.xlu1 %3038  ;;  %v3329_v29 = vmul.bf16 %v5292_v51, %v3321_v25  ;;  %v3326_v17 = vmul.bf16 %v5273_v43, %v3321_v25  ;;  %v3331_v52 = vmul.bf16 %v3321_v25, %v5302_v57  ;;  %v3699_v19 = vld [vmem:[%s6338_s1 + $0x48] sm:$0xff]  ;;  %v3702_v24 = vld [vmem:[%s6338_s1 + $0x60] sm:$0xff]  ;;  %v3705_v25 = vld [vmem:[%s6338_s1 + $0x78] sm:$0xff] }
 0x222   : > { %3403 = vrot.lane.b32.xlu0 %v3329_v29, %s6355_s15  ;;  %3397 = vrot.lane.b32.xlu1 %v3326_v17, %s6355_s15  ;;  %v3041_v31 = vpop.permute.xlu0 %3040 }
 0x223   : > { %v3048_v32 = vsel %vm810_vm2, %v3039_v27, %v3041_v31  ;;  %v3049_v33 = vsel %vm810_vm2, %v3041_v31, %v3037_v22  ;;  %v4900_v27 = vld [vmem:[%s6337_s0 + $0x130] sm:$0xff]   ;;  %v4902_v31 = vld [vmem:[%s6337_s0 + $0x138] sm:$0xff]  }
 0x224   : > { %v3045_v34 = vpop.permute.xlu1 %3044  ;;  %3088 = vmatprep.subr.bf16.mxu0 %v3049_v33 }
 0x225   : > { %v3051_v37 = vsel %vm810_vm2, %v3045_v34, %v3037_v22  ;;  %3089 = vmatpush1.bf16.msra.mxu0 %v3048_v32  ;;  %v3701_v22 = vld [vmem:[%s6338_s1 + $0x58] sm:$0xff] }
 0x226   : > { %3405 = vrot.lane.b32.xlu0 %v3330_v35, %s6355_s15  ;;  %3395 = vrot.lane.b32.xlu1 %v3325_v36, %s6355_s15  ;;  %v3043_v43 = vpop.permute.xlu0 %3042 }
 0x227   : > { %4447 = vmatprep.subr.msk.bf16.mxu0 %vm630_vm3, %v3051_v37  ;;  %v3050_v51 = vsel %vm810_vm2, %v3043_v43, %v3045_v34 }
 0x228   : > { %v3081_v59 = vsel %vm630_vm3, %v3050_v51, 0 }
 0x229   : > { %3091 = vmatpush1.bf16.msra.mxu0 %v3081_v59 }
 0x22a   : > { %3401 = vrot.lane.b32.xlu1 %v3328_v38, %s6355_s15  ;;  %v1618_v45 = vpop.permute.xlu0 %1617  ;;  %3708 = vperm.xlu0 %4814, %v3690_v4  }
 0x22c   : > { %4448 = vmatmul.mubr.msk.bf16.vlgmr.msra.gmra.mrb[0].mxu0 %vm605_vm4, %v4889_v44 }
 0x22d   : > { %3128 = vmatprep.mubr.bf16.mxu0 %v5112_v30 }
 0x22e   : > { %3407 = vrot.lane.b32.xlu1 %v3331_v52, %s6355_s15  ;;  %3723 = vperm.xlu0 %4814, %v3693_v8   ;;  %s6174_s15 = scalar_lea.vmem [#allocation7], %s4294_s22 }
 0x22f   : > { %s4153_s22 = sshll.u32 %s6174_s15, 4  ;;  %s6208_s22 = int_to_ptr.vmem [resolvable:$true] %s4153_s22 }
 0x230   : > { %s5008_s19 = scalar_lea.vmem %s6208_s22, 1024 }
 0x231   : > { %v1622_v47 = vpop.permute.xlu1 %1621  ;;  %p5009_p0 = scmp.ne.s32.totalorder %s6208_s22, %s5008_s19 }
 0x232   : > { %v1620_v48 = vpop.permute.xlu0 %1619  ;;  %3713 = vperm.xlu1 %4815, %v3691_v5   ;;  %3733 = vperm.xlu0 %4814, %v3695_v11  }
 0x233   : > { %v1632_v50 = vsel %vm1631_vm1, %v1618_v45, %v1620_v48  ;;  %v1633_v53 = vsel %vm1631_vm1, %v1620_v48, %v1622_v47  ;;  %v4906_v47 = vld [vmem:[%s6337_s0 + $0x210] sm:$0xff]   ;;  %v4907_v48 = vld [vmem:[%s6337_s0 + $0x218] sm:$0xff]   ;;  %p5010_p1 = pnand %p5009_p0, %p5207_p6 }
 0x234   : > { %1672 = vmatprep.subr.bf16.mxu1 %v1633_v53  ;;  %4449 = vmatmul.mubr.msk.bf16.gmra.mrb[4].mxu0 %vm605_vm4, %v4891_v49  ;;  %v4905_v49 = vld [vmem:[%s6337_s0 + $0x208] sm:$0xff]  }
 0x235   : > { %1673 = vmatpush1.bf16.msra.mxu1 %v1632_v50  ;;  %v1624_v57 = vpop.permute.xlu1 %1623  ;;  %3138 = vmatprep.mubr.bf16.mxu0 %v5112_v30  ;;  %v4908_v50 = vld [vmem:[%s6337_s0 + $0x220] sm:$0xff]   ;;  %v4909_v53 = vld [vmem:[%s6337_s0 + $0x228] sm:$0xff]   ;;  %p5011_p2 = pneg %p5010_p1 }
 0x236   : > { %v1634_v54 = vsel %vm1631_vm1, %v1618_v45, %v1624_v57  ;;  %v1626_v55 = vpop.permute.xlu0 %1625  ;;  %3718 = vperm.xlu1 %4815, %v3692_v7   ;;  %3743 = vperm.xlu0 %4814, %v3697_v15  }
 0x237   : > { %v1635_v56 = vsel %vm1631_vm1, %v1624_v57, %v1626_v55  ;;  %v4910_v57 = vld [vmem:[%s6337_s0 + $0x230] sm:$0xff]  }
 0x238   : > { %1674 = vmatprep.subr.bf16.mxu1 %v1635_v56 }
 0x239   : > { %1675 = vmatpush1.bf16.msra.mxu1 %v1634_v54  ;;  %v1628_v60 = vpop.permute.xlu1 %1627  ;;  %v4911_v54 = vld [vmem:[%s6337_s0 + $0x238] sm:$0xff]  }
 0x23a   : > { %v1636_v61 = vsel %vm1631_vm1, %v1618_v45, %v1628_v60  ;;  %v1630_v62 = vpop.permute.xlu0 %1629  ;;  %3728 = vperm.xlu1 %4815, %v3694_v10   ;;  %3753 = vperm.xlu0 %4814, %v3699_v19   ;;  %v4904_v45 = vld [vmem:[%s6337_s0 + $0x200] sm:$0xff]  }
 0x23b   : > { %v1667_v63 = vsel %vm630_vm3, %v1636_v61, 0  ;;  %v1637_v0 = vsel %vm1631_vm1, %v1628_v60, %v1630_v62  ;;  %v6020_v19 = vld [vmem:[%s6017_s20] sm:$0xff] }
 0x23c   : > { %4371 = vmatprep.subr.msk.bf16.mxu1 %vm630_vm3, %v1637_v0  ;;  %4450 = vmatmul.mubr.msk.bf16.gmra.mrb[8].mxu0 %vm605_vm4, %v4893_v58 }
 0x23d   : > { %1677 = vmatpush1.bf16.msra.mxu1 %v1667_v63  ;;  %3148 = vmatprep.mubr.bf16.mxu0 %v5112_v30 }
 0x23e   : > { %4495 = vmatprep.subr.bf16.mxu1 %v5363_v39  ;;  %v4897_v39 = vld [vmem:[%s6337_s0 + $0x1e0] sm:$0xff]   ;;  %3738 = vperm.xlu1 %4815, %v3696_v14  }
 0x23f   : > { %3763 = vperm.xlu0 %4814, %v3701_v22   ;;  %v6026_v22 = vld [vmem:[%s6017_s20 + $0x8] sm:$0xff] }
 0x240   : > { %4372 = vmatmul.mubr.msk.bf16.vlgmr.msra.gmra.mrb[0].mxu1 %vm605_vm4, %v4880_v1 }
 0x241   : > { %1714 = vmatprep.mubr.bf16.mxu1 %v5112_v30  ;;  %4498 = vmatpush1.bf16.msra.mxu1 %v5366_v40  ;;  %v4884_v40 = vld [vmem:[%s6337_s0 + $0xd0] sm:$0xff]  }
 0x242   : > { %4496 = vmatprep.subr.bf16.mxu1 %v5369_v41  ;;  %v4899_v41 = vld [vmem:[%s6337_s0 + $0x1e8] sm:$0xff]   ;;  %3748 = vperm.xlu1 %4815, %v3698_v18  }
 0x243   : > { %3773 = vperm.xlu0 %4814, %v3703_v20   ;;  %v6032_v20 = vld [vmem:[%s6017_s20 + $0x10] sm:$0xff] }
 0x244   : > { %4451 = vmatmul.mubr.msk.bf16.gmra.mrb[12].mxu0 %vm605_vm4, %v4895_v2 }
 0x245   : > { %4499 = vmatpush1.bf16.msra.mxu1 %v5375_v28  ;;  %3158 = vmatprep.mubr.bf16.mxu0 %v5112_v30  ;;  %v4886_v28 = vld [vmem:[%s6337_s0 + $0xd8] sm:$0xff]  }
 0x246   : > { %4497 = vmatprep.subr.msk.bf16.mxu1 %vm630_vm3, %v5380_v42  ;;  %v4901_v42 = vld [vmem:[%s6337_s0 + $0x1f0] sm:$0xff]   ;;  %3758 = vperm.xlu1 %4815, %v3700_v21   ;;  %v3826_v21 = vld [vmem:[%s6340_s3] sm:$0xff] }
 0x247   : > { %3783 = vperm.xlu0 %4814, %v3705_v25  }
 0x248   : > { %4373 = vmatmul.mubr.msk.bf16.gmra.mrb[4].mxu1 %vm605_vm4, %v4882_v3 }
 0x249   : > { %1724 = vmatprep.mubr.bf16.mxu1 %v5112_v30  ;;  %4500 = vmatpush1.bf16.msra.mxu1 %v5387_v46  ;;  %v4888_v46 = vld [vmem:[%s6337_s0 + $0xe0] sm:$0xff]  }
 0x24a   : > { %3768 = vperm.xlu1 %4815, %v3702_v24  }
 0x24c   : > { %4452 = vmatmul.mubr.msk.bf16.gmra.mrb[16].mxu0 %vm605_vm4, %v4897_v39 }
 0x24d   : > { %3168 = vmatprep.mubr.bf16.mxu0 %v5112_v30 }
 0x24e   : > { %3778 = vperm.xlu1 %4815, %v3704_v26   ;;  %v3828_v26 = vld [vmem:[%s6340_s3 + $0x10] sm:$0xff] }
 0x250   : > { %4374 = vmatmul.mubr.msk.bf16.gmra.mrb[8].mxu1 %vm605_vm4, %v4884_v40 }
 0x251   : > { %1734 = vmatprep.mubr.bf16.mxu1 %v5112_v30 }
 0x254   : > { %4453 = vmatmul.mubr.msk.bf16.gmra.mrb[20].mxu0 %vm605_vm4, %v4899_v41 }
 0x255   : > { %3178 = vmatprep.mubr.bf16.mxu0 %v5112_v30 }
 0x258   : > { %4375 = vmatmul.mubr.msk.bf16.gmra.mrb[12].mxu1 %vm605_vm4, %v4886_v28 }
 0x259   : > { %1744 = vmatprep.mubr.bf16.mxu1 %v5112_v30 }
 0x25c   : > { %4454 = vmatmul.mubr.msk.bf16.gmra.mrb[24].mxu0 %vm605_vm4, %v4901_v42 }
 0x25d   : > { %3188 = vmatprep.mubr.bf16.mxu0 %v5112_v30 }
 0x260   : > { %4376 = vmatmul.mubr.msk.bf16.gmra.mrb[16].mxu1 %vm605_vm4, %v4888_v46 }
 0x261   : > { %1754 = vmatprep.mubr.bf16.mxu1 %v5112_v30 }
 0x264   : > { %4455 = vmatmul.mubr.msk.bf16.gmra.mrb[28].mxu0 %vm605_vm4, %v4903_v6 }
 0x265   : > { %3481 = vmatprep.mubr.bf16.mxu0 %v5112_v30 }
 0x268   : > { %4377 = vmatmul.mubr.msk.bf16.gmra.mrb[20].mxu1 %vm605_vm4, %v4890_v9 }
 0x269   : > { %1764 = vmatprep.mubr.bf16.mxu1 %v5112_v30 }
 0x270   : > { %4378 = vmatmul.mubr.msk.bf16.gmra.mrb[24].mxu1 %vm605_vm4, %v4892_v12 }
 0x271   : > { %1774 = vmatprep.mubr.bf16.mxu1 %v5112_v30 }
 0x278   : > { %4379 = vmatmul.mubr.msk.bf16.gmra.mrb[28].mxu1 %vm605_vm4, %v4894_v13 }
 0x279   : > { %2065 = vmatprep.mubr.bf16.mxu1 %v5112_v30 }
 0x280   : > { %4395 = vmatmul.mubr.msk.bf16.vlgmr.msra.gmra.mrb[16].mxu1 %vm605_vm4, %v4896_v16 }
 0x281   : > { %2075 = vmatprep.mubr.bf16.mxu1 %v5112_v30 }
 0x288   : > { %4396 = vmatmul.mubr.msk.bf16.gmra.mrb[20].mxu1 %vm605_vm4, %v4898_v23  ;;  %v3827_v23 = vld [vmem:[%s6340_s3 + $0x8] sm:$0xff] }
 0x289   : > { %2085 = vmatprep.mubr.bf16.mxu1 %v5112_v30 }
 0x28d   : > { %v3400_v29 = vpop.permute.xlu0 %3399 }
 0x290   : > { %4397 = vmatmul.mubr.msk.bf16.gmra.mrb[24].mxu1 %vm605_vm4, %v4900_v27 }
 0x291   : > { %2095 = vmatprep.mubr.bf16.mxu1 %v5112_v30 }
 0x294   : > { %v3398_v17 = vpop.permute.xlu1 %3397  ;;  %v3404_v33 = vpop.permute.xlu0 %3403 }
 0x295   : > { %v3410_v32 = vsel %vm505_vm0, %v3398_v17, %v3400_v29  ;;  %v3412_v36 = vsel %vm505_vm0, %v3404_v33, %v3400_v29 }
 0x296   : > { %3449 = vmatprep.subr.bf16.mxu0 %v3410_v32 }
 0x298   : > { %v3396_v34 = vpop.permute.xlu1 %3395  ;;  %4398 = vmatmul.mubr.msk.bf16.gmra.mrb[28].mxu1 %vm605_vm4, %v4902_v31  ;;  %v3406_v51 = vpop.permute.xlu0 %3405  ;;  %v3829_v31 = vld [vmem:[%s6340_s3 + $0x18] sm:$0xff] }
 0x299   : > { %v3409_v35 = vsel %vm505_vm0, %v3396_v34, %v3398_v17  ;;  %v6039_v17 = vld [vmem:[%s6017_s20 + $0x18] sm:$0xff]  ;;  %v3835_v34 = vmul.f32 %v3827_v23, %v6026_v22 }
 0x29a   : > { %3450 = vmatpush1.bf16.msra.mxu0 %v3409_v35  ;;  %v3833_v23 = vld [vmem:[%s6340_s3 + $0x38] sm:$0xff] }
 0x29b   : > { %3451 = vmatprep.subr.bf16.mxu0 %v3412_v36 }
 0x29c   : > { %v3402_v37 = vpop.permute.xlu1 %3401 }
 0x29d   : > { %v3411_v43 = vsel %vm505_vm0, %v3402_v37, %v3404_v33 }
 0x29e   : > { %3452 = vmatpush1.bf16.msra.mxu0 %v3411_v43 }
 0x2a0   : > { %v3408_v59 = vpop.permute.xlu1 %3407 }
 0x2a1   : > { %v3413_v38 = vsel %vm505_vm0, %v3406_v51, %v3408_v59  ;;  %v3414_v44 = vsel %vm505_vm0, %v3408_v59, %v3400_v29  ;;  %v3834_v29 = vmul.f32 %v3826_v21, %v6020_v19  ;;  %v3836_v51 = vmul.f32 %v3828_v26, %v6032_v20  ;;  %v6066_v21 = vld [vmem:[%s6017_s20 + $0x38] sm:$0xff] }
 0x2a2   : > { %v3444_v52 = vsel %vm630_vm3, %v3413_v38, 0  ;;  %4466 = vmatprep.subr.msk.bf16.mxu0 %vm630_vm3, %v3414_v44  ;;  %v3837_v44 = vmul.f32 %v3829_v31, %v6039_v17 }
 0x2a3   : > { %3454 = vmatpush1.bf16.msra.mxu0 %v3444_v52 }
 0x2a6   : > { %4467 = vmatmul.mubr.msk.bf16.vlgmr.msra.gmra.mrb[0].mxu0 %vm605_vm4, %v4904_v45  ;;  %v6048_v45 = vld [vmem:[%s6017_s20 + $0x20] sm:$0xff] }
 0x2a7   : > { %3491 = vmatprep.mubr.bf16.mxu0 %v5112_v30 }
 0x2a9   : > { %v3709_v35 = vpop.permute.xlu0 %3708 }
 0x2ae   : > { %4468 = vmatmul.mubr.msk.bf16.gmra.mrb[4].mxu0 %vm605_vm4, %v4905_v49 }
 0x2af   : > { %3501 = vmatprep.mubr.bf16.mxu0 %v5112_v30 }
 0x2b1   : > { %v3714_v52 = vpop.permute.xlu1 %3713 }
 0x2b6   : > { %4469 = vmatmul.mubr.msk.bf16.gmra.mrb[8].mxu0 %vm605_vm4, %v4906_v47 }
 0x2b7   : > { %3511 = vmatprep.mubr.bf16.mxu0 %v5112_v30 }
 0x2be   : > { %4470 = vmatmul.mubr.msk.bf16.gmra.mrb[12].mxu0 %vm605_vm4, %v4907_v48  ;;  %v6051_v48 = vld [vmem:[%s6017_s20 + $0x28] sm:$0xff] }
 0x2bf   : > { %3521 = vmatprep.mubr.bf16.mxu0 %v5112_v30 }
 0x2c6   : > { %4471 = vmatmul.mubr.msk.bf16.gmra.mrb[16].mxu0 %vm605_vm4, %v4908_v50  ;;  %v3830_v50 = vld [vmem:[%s6340_s3 + $0x20] sm:$0xff] }
 0x2c7   : > { %3531 = vmatprep.mubr.bf16.mxu0 %v5112_v30 }
 0x2ce   : > { %4472 = vmatmul.mubr.msk.bf16.gmra.mrb[20].mxu0 %vm605_vm4, %v4909_v53  ;;  %v3831_v53 = vld [vmem:[%s6340_s3 + $0x28] sm:$0xff] }
 0x2cf   : > { %3541 = vmatprep.mubr.bf16.mxu0 %v5112_v30 }
 0x2d6   : > { %4473 = vmatmul.mubr.msk.bf16.gmra.mrb[24].mxu0 %vm605_vm4, %v4910_v57 }
 0x2d7   : > { %3551 = vmatprep.mubr.bf16.mxu0 %v5112_v30 }
 0x2de   : > { %4474 = vmatmul.mubr.msk.bf16.gmra.mrb[28].mxu0 %vm605_vm4, %v4911_v54 }
 0x313   : > { %v1706_v55 = vpop.f32.mrb[0].mxu1 }
 0x314   : > { %v1708_v56 = vpop.f32.mrb[1].mxu1 }
 0x315   : > { %v1710_v58 = vpop.f32.mrb[2].mxu1 }
 0x316   : > { %v1712_v60 = vpop.f32.mrb[3].mxu1 }
 0x31b   : > { %v5958_v61 = vpop.f32.mrb[4].mxu1 }
 0x31c   : > { %v5960_v62 = vpop.f32.mrb[5].mxu1 }
 0x31d   : > { %v5962_v63 = vpop.f32.mrb[6].mxu1 }
 0x31e   : > { %v5964_v0 = vpop.f32.mrb[7].mxu1 }
 0x323   : > { %v5966_v1 = vpop.f32.mrb[8].mxu1 }
 0x324   : > { %v5968_v30 = vpop.f32.mrb[9].mxu1 }
 0x325   : > { %v5970_v2 = vpop.f32.mrb[10].mxu1 }
 0x326   : > { %v5972_v3 = vpop.f32.mrb[11].mxu1 }
 0x32b   : > { %v5974_v39 = vpop.f32.mrb[12].mxu1 }
 0x32c   : > { %v5976_v40 = vpop.f32.mrb[13].mxu1 }
 0x32d   : > { %v5978_v41 = vpop.f32.mrb[14].mxu1 }
 0x32e   : > { %v5980_v28 = vpop.f32.mrb[15].mxu1 }
 0x353   : > { %v5982_v42 = vpop.f32.mrb[16].mxu1 }
 0x354   : > { %v5984_v46 = vpop.f32.mrb[17].mxu1 }
 0x355   : > { %v5986_v4 = vpop.f32.mrb[18].mxu1 }
 0x356   : > { %v5988_v5 = vpop.f32.mrb[19].mxu1 }
 0x35b   : > { %v5990_v6 = vpop.f32.mrb[20].mxu1 }
 0x35c   : > { %v5992_v7 = vpop.f32.mrb[21].mxu1 }
 0x35d   : > { %v5994_v8 = vpop.f32.mrb[22].mxu1 }
 0x35e   : > { %v5996_v9 = vpop.f32.mrb[23].mxu1 }
 0x363   : > { %v5998_v10 = vpop.f32.mrb[24].mxu1 }
 0x364   : > { %v6000_v11 = vpop.f32.mrb[25].mxu1 }
 0x365   : > { %v6002_v12 = vpop.f32.mrb[26].mxu1 }
 0x366   : > { %v6004_v13 = vpop.f32.mrb[27].mxu1 }
 0x36b   : > { %v6006_v14 = vpop.f32.mrb[28].mxu1 }
 0x36c   : > { %v6008_v15 = vpop.f32.mrb[29].mxu1 }
 0x36d   : > { %v6010_v16 = vpop.f32.mrb[30].mxu1 }
 0x36e   : > { %v6012_v18 = vpop.f32.mrb[31].mxu1 }
 0x379   : > { %v3483_v24 = vpop.f32.mrb[0].mxu0 }
 0x37a   : > { %v4501_v25 = vadd.f32 %v3483_v24, %v1706_v55  ;;  %v3485_v27 = vpop.f32.mrb[1].mxu0  ;;  %v6060_v55 = vld [vmem:[%s6017_s20 + $0x30] sm:$0xff]  ;;  %s5113_s20 = smov [#allocation7]  }
 0x37b   : > { %v4502_v32 = vadd.f32 %v3485_v27, %v1708_v56  ;;  %v3487_v33 = vpop.f32.mrb[2].mxu0  ;;  %v3832_v56 = vld [vmem:[%s6340_s3 + $0x30] sm:$0xff]  ;;  %v3838_v27 = vmul.f32 %v3830_v50, %v6048_v45 }
 0x37c   : > { %v4503_v36 = vadd.f32 %v3487_v33, %v1710_v58  ;;  %v3786_v37 = vadd.f32 %v4501_v25, %v3709_v35  ;;  %v3489_v43 = vpop.f32.mrb[3].mxu0 }
 0x37d   : > { %v3787_v59 = vadd.f32 %v4502_v32, %v3709_v35  ;;  %v4504_v38 = vadd.f32 %v3489_v43, %v1712_v60  ;;  %v3840_v35 = vmul.f32 %v3832_v56, %v6060_v55 }
 0x37e   : > { %v3842_v49 = vadd.f32 %v3834_v29, %v3786_v37  ;;  %v3788_v47 = vadd.f32 %v4503_v36, %v3714_v52  ;;  %v3839_v29 = vmul.f32 %v3831_v53, %v6051_v48 }
 0x37f   : > { %v3843_v57 = vadd.f32 %v3835_v34, %v3787_v59  ;;  %v3789_v54 = vadd.f32 %v4504_v38, %v3714_v52  ;;  %v3841_v38 = vmul.f32 %v3833_v23, %v6066_v21 }
 0x380   : > { %v3850_v58 = vsub.f32 0.0, %v3842_v49  ;;  %v3844_v60 = vadd.f32 %v3836_v51, %v3788_v47  ;;  %v3719_v51 = vpop.permute.xlu1 %3718 }
 0x381   : > { %v3851_v24 = vsub.f32 0.0, %v3843_v57  ;;  %v3845_v26 = vadd.f32 %v3837_v44, %v3789_v54  ;;  %v3493_v25 = vpop.f32.mrb[4].mxu0  ;;  %v3724_v57 = vpop.permute.xlu0 %3723  ;;  %v3899_v54 = vld [vmem:[%s6340_s3 + $0x48] sm:$0xff] }
 0x382   : > { %v3858_v31 = vmul.f32 1.442695, %v3850_v58  ;;  %v3852_v32 = vsub.f32 0.0, %v3844_v60  ;;  %v4505_v33 = vadd.f32 %v3493_v25, %v5958_v61  ;;  %v3495_v34 = vpop.f32.mrb[5].mxu0 }
 0x383   : > { %v3860_v36 = vmul.f32 1.442695, %v3851_v24  ;;  %v3853_v37 = vsub.f32 0.0, %v3845_v26  ;;  %v4506_v43 = vadd.f32 %v3495_v34, %v5960_v62  ;;  %v3497_v59 = vpop.f32.mrb[6].mxu0  ;;  %v3898_v62 = vld [vmem:[%s6340_s3 + $0x40] sm:$0xff] }
 0x384   : > { %4912 = vpow2.f32 %v3858_v31  ;;  %v3862_v44 = vmul.f32 1.442695, %v3852_v32  ;;  %v3790_v52 = vadd.f32 %v4505_v33, %v3719_v51  ;;  %v4507_v49 = vadd.f32 %v3497_v59, %v5962_v63  ;;  %v3499_v47 = vpop.f32.mrb[7].mxu0  ;;  %v3900_v63 = vld [vmem:[%s6340_s3 + $0x50] sm:$0xff]  ;;  %v3902_v24 = vld [vmem:[%s6340_s3 + $0x60] sm:$0xff]  ;;  %v3903_v32 = vld [vmem:[%s6340_s3 + $0x68] sm:$0xff] }
 0x385   : > { %4914 = vpow2.f32 %v3860_v36  ;;  %v3864_v50 = vmul.f32 1.442695, %v3853_v37  ;;  %v3791_v61 = vadd.f32 %v4506_v43, %v3719_v51  ;;  %v4508_v53 = vadd.f32 %v3499_v47, %v5964_v0  ;;  %v3901_v0 = vld [vmem:[%s6340_s3 + $0x58] sm:$0xff] }
 0x386   : > { %4916 = vpow2.f32 %v3862_v44  ;;  %v3846_v56 = vadd.f32 %v3838_v27, %v3790_v52  ;;  %v3792_v58 = vadd.f32 %v4507_v49, %v3724_v57  ;;  %v3906_v27 = vmul.f32 %v3898_v62, %v6020_v19 }
 0x387   : > { %4918 = vpow2.f32 %v3864_v50  ;;  %v3847_v60 = vadd.f32 %v3839_v29, %v3791_v61  ;;  %v3793_v23 = vadd.f32 %v4508_v53, %v3724_v57  ;;  %v3907_v31 = vmul.f32 %v3899_v54, %v6026_v22  ;;  %v3729_v50 = vpop.permute.xlu1 %3728  ;;  %v3904_v53 = vld [vmem:[%s6340_s3 + $0x70] sm:$0xff] }
 0x388   : > { %v3854_v26 = vsub.f32 0.0, %v3846_v56  ;;  %v3848_v25 = vadd.f32 %v3840_v35, %v3792_v58  ;;  %v3908_v29 = vmul.f32 %v3900_v63, %v6032_v20  ;;  %v3909_v37 = vmul.f32 %v3901_v0, %v6039_v17  ;;  %v3734_v63 = vpop.permute.xlu0 %3733  ;;  %v3905_v0 = vld [vmem:[%s6340_s3 + $0x78] sm:$0xff] }
 0x389   : > { %v3855_v33 = vsub.f32 0.0, %v3847_v60  ;;  %v3849_v34 = vadd.f32 %v3841_v38, %v3793_v23  ;;  %v3503_v36 = vpop.f32.mrb[8].mxu0  ;;  %v6103_v44 = vmul.f32 %v3902_v24, %v6048_v45  ;;  %v6107_v38 = vmul.f32 %v3903_v32, %v6051_v48 }
 0x38a   : > { %v3866_v43 = vmul.f32 1.442695, %v3854_v26  ;;  %v3856_v51 = vsub.f32 0.0, %v3848_v25  ;;  %v4509_v59 = vadd.f32 %v3503_v36, %v5966_v1  ;;  %v3505_v35 = vpop.f32.mrb[9].mxu0  ;;  %v3912_v26 = vmul.f32 %v3904_v53, %v6060_v55 }
 0x38b   : > { %v3868_v52 = vmul.f32 1.442695, %v3855_v33  ;;  %v3857_v49 = vsub.f32 0.0, %v3849_v34  ;;  %v4510_v47 = vadd.f32 %v3505_v35, %v5968_v30  ;;  %v3507_v61 = vpop.f32.mrb[10].mxu0 }
 0x38c   : > { %4920 = vpow2.f32 %v3866_v43  ;;  %v3870_v57 = vmul.f32 1.442695, %v3856_v51  ;;  %v3794_v1 = vadd.f32 %v4509_v59, %v3729_v50  ;;  %v4511_v62 = vadd.f32 %v3507_v61, %v5970_v2  ;;  %v3509_v54 = vpop.f32.mrb[11].mxu0 }
 0x38d   : > { %4922 = vpow2.f32 %v3868_v52  ;;  %v3872_v56 = vmul.f32 1.442695, %v3857_v49  ;;  %v3795_v58 = vadd.f32 %v4510_v47, %v3729_v50  ;;  %v4512_v30 = vadd.f32 %v3509_v54, %v5972_v3 }
 0x38e   : > { %v4913_v60 = vpop.eup %4912  ;;  %4924 = vpow2.f32 %v3870_v57  ;;  %v3914_v23 = vadd.f32 %v3906_v27, %v3794_v1  ;;  %v3796_v24 = vadd.f32 %v4511_v62, %v3734_v63  ;;  %v3913_v51 = vmul.f32 %v3905_v0, %v6066_v21 }
 0x38f   : > { %v4915_v25 = vpop.eup %4914  ;;  %v3874_v32 = vadd.f32 1.0, %v4913_v60  ;;  %4926 = vpow2.f32 %v3872_v56  ;;  %v3915_v2 = vadd.f32 %v3907_v31, %v3795_v58  ;;  %v3797_v33 = vadd.f32 %v4512_v30, %v3734_v63  ;;  %v3739_v56 = vpop.permute.xlu1 %3738 }
 0x390   : > { %v4917_v34 = vpop.eup %4916  ;;  %v3875_v36 = vadd.f32 1.0, %v4915_v25  ;;  %v3922_v43 = vsub.f32 0.0, %v3914_v23  ;;  %v3916_v3 = vadd.f32 %v3908_v29, %v3796_v24  ;;  %v3744_v60 = vpop.permute.xlu0 %3743 }
 0x391   : > { %v4919_v59 = vpop.eup %4918  ;;  %4928 = vrcp.f32 %v3874_v32  ;;  %v3876_v35 = vadd.f32 1.0, %v4917_v34  ;;  %v3923_v52 = vsub.f32 0.0, %v3915_v2  ;;  %v3917_v49 = vadd.f32 %v3909_v37, %v3797_v33  ;;  %v3513_v27 = vpop.f32.mrb[12].mxu0 }
 0x392   : > { %4930 = vrcp.f32 %v3875_v36  ;;  %v3877_v47 = vadd.f32 1.0, %v4919_v59  ;;  %v3930_v50 = vmul.f32 1.442695, %v3922_v43  ;;  %v3924_v61 = vsub.f32 0.0, %v3916_v3  ;;  %v3515_v53 = vpop.f32.mrb[13].mxu0 }
 0x393   : > { %4932 = vrcp.f32 %v3876_v35  ;;  %v3932_v31 = vmul.f32 1.442695, %v3923_v52  ;;  %v3925_v57 = vsub.f32 0.0, %v3917_v49  ;;  %v4513_v1 = vadd.f32 %v3513_v27, %v5974_v39  ;;  %v3517_v62 = vpop.f32.mrb[14].mxu0 }
 0x394   : > { %4934 = vrcp.f32 %v3877_v47  ;;  %v3934_v29 = vmul.f32 1.442695, %v3924_v61  ;;  %v4514_v54 = vadd.f32 %v3515_v53, %v5976_v40  ;;  %v4515_v58 = vadd.f32 %v3517_v62, %v5978_v41  ;;  %v3519_v37 = vpop.f32.mrb[15].mxu0 }
 0x395   : > { %4936 = vpow2.f32 %v3930_v50  ;;  %v3936_v30 = vmul.f32 1.442695, %v3925_v57  ;;  %v3798_v63 = vadd.f32 %v4513_v1, %v3739_v56  ;;  %v4516_v0 = vadd.f32 %v3519_v37, %v5980_v28 }
 0x396   : > { %v4921_v23 = vpop.eup %4920  ;;  %4938 = vpow2.f32 %v3932_v31  ;;  %v3799_v24 = vadd.f32 %v4514_v54, %v3739_v56  ;;  %v3800_v25 = vadd.f32 %v4515_v58, %v3744_v60 }
 0x397   : > { %v4923_v39 = vpop.eup %4922  ;;  %v3878_v32 = vadd.f32 1.0, %v4921_v23  ;;  %4940 = vpow2.f32 %v3934_v29  ;;  %v3918_v2 = vadd.f32 %v6103_v44, %v3798_v63  ;;  %v3801_v40 = vadd.f32 %v4516_v0, %v3744_v60  ;;  %v3754_v63 = vpop.permute.xlu0 %3753 }
 0x398   : > { %v4925_v33 = vpop.eup %4924  ;;  %v3879_v34 = vadd.f32 1.0, %v4923_v39  ;;  %4942 = vpow2.f32 %v3936_v30  ;;  %v3919_v41 = vadd.f32 %v6107_v38, %v3799_v24  ;;  %v3920_v36 = vadd.f32 %v3912_v26, %v3800_v25 }
 0x399   : > { %v4927_v43 = vpop.eup %4926  ;;  %4944 = vrcp.f32 %v3878_v32  ;;  %v3880_v28 = vadd.f32 1.0, %v4925_v33  ;;  %v3926_v3 = vsub.f32 0.0, %v3918_v2  ;;  %v3921_v59 = vadd.f32 %v3913_v51, %v3801_v40  ;;  %v3523_v35 = vpop.f32.mrb[16].mxu0 }
 0x39a   : > { %4946 = vrcp.f32 %v3879_v34  ;;  %v3881_v52 = vadd.f32 1.0, %v4927_v43  ;;  %v3927_v49 = vsub.f32 0.0, %v3919_v41  ;;  %v3928_v27 = vsub.f32 0.0, %v3920_v36  ;;  %v3525_v47 = vpop.f32.mrb[17].mxu0  ;;  %v3749_v51 = vpop.permute.xlu1 %3748 }
 0x39b   : > { %v4929_v50 = vpop.eup %4928  ;;  %4948 = vrcp.f32 %v3880_v28  ;;  %v3938_v44 = vmul.f32 1.442695, %v3926_v3  ;;  %v3929_v61 = vsub.f32 0.0, %v3921_v59  ;;  %v4517_v53 = vadd.f32 %v3523_v35, %v5982_v42  ;;  %v3527_v31 = vpop.f32.mrb[18].mxu0 }
 0x39c   : > { %v4931_v38 = vpop.eup %4930  ;;  %4950 = vrcp.f32 %v3881_v52  ;;  %v3940_v26 = vmul.f32 1.442695, %v3927_v49  ;;  %v3942_v57 = vmul.f32 1.442695, %v3928_v27  ;;  %v4518_v1 = vadd.f32 %v3525_v47, %v5984_v46  ;;  %v3529_v62 = vpop.f32.mrb[19].mxu0 }
 0x39d   : > { %v4933_v29 = vpop.eup %4932  ;;  %4952 = vpow2.f32 %v3938_v44  ;;  %v3944_v54 = vmul.f32 1.442695, %v3929_v61  ;;  %v3802_v56 = vadd.f32 %v4517_v53, %v3749_v51  ;;  %v4519_v58 = vadd.f32 %v3527_v31, %v5986_v4 }
 0x39e   : > { %v4935_v37 = vpop.eup %4934  ;;  %4954 = vpow2.f32 %v3940_v26  ;;  %v3803_v30 = vadd.f32 %v4518_v1, %v3749_v51  ;;  %v4520_v42 = vadd.f32 %v3529_v62, %v5988_v5  ;;  %v3764_v26 = vpop.permute.xlu0 %3763 }
 0x39f   : > { %v4937_v0 = vpop.eup %4936  ;;  %4956 = vpow2.f32 %v3942_v57  ;;  %v3978_v60 = vmax.f32 %v3802_v56, 0.0  ;;  %v3804_v23 = vadd.f32 %v4519_v58, %v3754_v63 }
 0x3a0   : > { %v4939_v24 = vpop.eup %4938  ;;  %v3946_v46 = vadd.f32 1.0, %v4937_v0  ;;  %4958 = vpow2.f32 %v3944_v54  ;;  %v3979_v25 = vmax.f32 %v3803_v30, 0.0  ;;  %v3805_v39 = vadd.f32 %v4520_v42, %v3754_v63 }
 0x3a1   : > { %v4941_v32 = vpop.eup %4940  ;;  %v3947_v2 = vadd.f32 1.0, %v4939_v24  ;;  %v6129_v40 = vmul.f32 %v4929_v50, %v3978_v60  ;;  %v3980_v4 = vmax.f32 %v3804_v23, 0.0  ;;  %v3533_v33 = vpop.f32.mrb[20].mxu0 }
 0x3a2   : > { %v4943_v34 = vpop.eup %4942  ;;  %4960 = vrcp.f32 %v3946_v46  ;;  %v3948_v41 = vadd.f32 1.0, %v4941_v32  ;;  %v6131_v5 = vmul.f32 %v4931_v38, %v3979_v25  ;;  %v3981_v36 = vmax.f32 %v3805_v39, 0.0  ;;  %v3535_v43 = vpop.f32.mrb[21].mxu0 }
 0x3a3   : > { %v4945_v28 = vpop.eup %4944  ;;  %4962 = vrcp.f32 %v3947_v2  ;;  %v3949_v3 = vadd.f32 1.0, %v4943_v34  ;;  %v6133_v59 = vmul.f32 %v4933_v29, %v3980_v4  ;;  %v4521_v35 = vadd.f32 %v3533_v33, %v5990_v6  ;;  %v3537_v52 = vpop.f32.mrb[22].mxu0 }
 0x3a4   : > { %v4947_v49 = vpop.eup %4946  ;;  %4964 = vrcp.f32 %v3948_v41  ;;  %v6136_v27 = vmul.f32 %v4935_v37, %v3981_v36  ;;  %v4522_v47 = vadd.f32 %v3535_v43, %v5992_v7  ;;  %v3759_v50 = vpop.permute.xlu1 %3758  ;;  %v4523_v44 = vadd.f32 %v3537_v52, %v5994_v8  ;;  %v4003_v52 = vld [vmem:[%s6340_s3 + $0x88] sm:$0xff] }
 0x3a5   : > { %v3539_v61 = vpop.f32.mrb[23].mxu0  ;;  %v4949_v53 = vpop.eup %4948  ;;  %4966 = vrcp.f32 %v3949_v3  ;;  %v3806_v31 = vadd.f32 %v4521_v35, %v3759_v50 }
 0x3a6   : > { %v4524_v38 = vadd.f32 %v3539_v61, %v5996_v9  ;;  %v4951_v57 = vpop.eup %4950  ;;  %v3807_v1 = vadd.f32 %v4522_v47, %v3759_v50  ;;  %v3808_v6 = vadd.f32 %v4523_v44, %v3764_v26 }
 0x3a7   : > { %v4953_v51 = vpop.eup %4952  ;;  %v3982_v62 = vmax.f32 %v3806_v31, 0.0 }
 0x3a8   : > { %v3809_v29 = vadd.f32 %v4524_v38, %v3764_v26  ;;  %v4955_v54 = vpop.eup %4954  ;;  %v3950_v56 = vadd.f32 1.0, %v4953_v51  ;;  %v3983_v58 = vmax.f32 %v3807_v1, 0.0  ;;  %v3984_v7 = vmax.f32 %v3808_v6, 0.0 }
 0x3a9   : > { %v4957_v37 = vpop.eup %4956  ;;  %v3951_v30 = vadd.f32 1.0, %v4955_v54  ;;  %v6141_v8 = vmul.f32 %v4945_v28, %v3982_v62  ;;  %v3543_v63 = vpop.f32.mrb[24].mxu0 }
 0x3aa   : > { %v3985_v42 = vmax.f32 %v3809_v29, 0.0  ;;  %v4959_v0 = vpop.eup %4958  ;;  %4968 = vrcp.f32 %v3950_v56  ;;  %v3952_v9 = vadd.f32 1.0, %v4957_v37  ;;  %v6143_v60 = vmul.f32 %v4947_v49, %v3983_v58  ;;  %v3545_v24 = vpop.f32.mrb[25].mxu0  ;;  %v4004_v49 = vld [vmem:[%s6340_s3 + $0x90] sm:$0xff] }
 0x3ab   : > { %v6145_v23 = vmul.f32 %v4949_v53, %v3984_v7  ;;  %4970 = vrcp.f32 %v3951_v30  ;;  %v3953_v46 = vadd.f32 1.0, %v4959_v0  ;;  %v4525_v39 = vadd.f32 %v3543_v63, %v5998_v10  ;;  %v3547_v32 = vpop.f32.mrb[26].mxu0  ;;  %v4002_v10 = vld [vmem:[%s6340_s3 + $0x80] sm:$0xff]  ;;  %v3774_v53 = vpop.permute.xlu0 %3773 }
 0x3ac   : > { %v6147_v25 = vmul.f32 %v4951_v57, %v3985_v42  ;;  %v4961_v2 = vpop.eup %4960  ;;  %4972 = vrcp.f32 %v3952_v9  ;;  %v4526_v4 = vadd.f32 %v3545_v24, %v6000_v11  ;;  %v4527_v33 = vadd.f32 %v3547_v32, %v6002_v12  ;;  %v3549_v34 = vpop.f32.mrb[27].mxu0 }
 0x3ad   : > { %v4963_v41 = vpop.eup %4962  ;;  %4974 = vrcp.f32 %v3953_v46  ;;  %v3970_v36 = vmul.f32 %v4961_v2, %v6020_v19  ;;  %v4528_v43 = vadd.f32 %v3549_v34, %v6004_v13 }
 0x3ae   : > { %v4965_v28 = vpop.eup %4964  ;;  %v3971_v3 = vmul.f32 %v4963_v41, %v6026_v22  ;;  %v3769_v22 = vpop.permute.xlu1 %3768  ;;  %v3812_v57 = vadd.f32 %v4527_v33, %v3774_v53 }
 0x3af   : > { %v4967_v35 = vpop.eup %4966  ;;  %v6159_v11 = vadd.f32 %v6129_v40, %v3970_v36  ;;  %v3972_v12 = vmul.f32 %v4965_v28, %v6032_v20  ;;  %v3810_v40 = vadd.f32 %v4525_v39, %v3769_v22  ;;  %v3811_v44 = vadd.f32 %v4526_v4, %v3769_v22  ;;  %v4008_v4 = vld [vmem:[%s6340_s3 + $0xb0] sm:$0xff] }
 0x3b0   : > { %v6166_v19 = vadd.f32 %v6131_v5, %v3971_v3  ;;  %v3973_v13 = vmul.f32 %v4967_v35, %v6039_v17  ;;  %v4005_v17 = vld [vmem:[%s6340_s3 + $0x98] sm:$0xff]  ;;  %v3813_v29 = vadd.f32 %v4528_v43, %v3774_v53 }
 0x3b1   : > { %4110 = vst [vmem:[%s6174_s15] sm:$0xff] %v6159_v11  ;;  %v6179_v20 = vadd.f32 %v6133_v59, %v3972_v12  ;;  %v4010_v5 = vmul.f32 %v4002_v10, %v6159_v11  ;;  %v3553_v47 = vpop.f32.mrb[28].mxu0  ;;  %v3784_v10 = vpop.permute.xlu0 %3783 }
 0x3b2   : > { %4111 = vst [vmem:[%s6174_s15 + $0x8] sm:$0xff] %v6166_v19  ;;  %v6188_v50 = vadd.f32 %v6136_v27, %v3973_v13  ;;  %v4011_v61 = vmul.f32 %v4003_v52, %v6166_v19  ;;  %v4529_v59 = vadd.f32 %v3553_v47, %v6006_v14  ;;  %v3555_v31 = vpop.f32.mrb[29].mxu0 }
 0x3b3   : > { %4112 = vst [vmem:[%s6174_s15 + $0x10] sm:$0xff] %v6179_v20  ;;  %v4018_v38 = vadd.f32 %v4010_v5, %v3810_v40  ;;  %v4012_v26 = vmul.f32 %v4004_v49, %v6179_v20  ;;  %v4530_v1 = vadd.f32 %v3555_v31, %v6008_v15  ;;  %v3557_v6 = vpop.f32.mrb[30].mxu0 }
 0x3b4   : > { %v4969_v51 = vpop.eup %4968  ;;  %4113 = vst [vmem:[%s6174_s15 + $0x18] sm:$0xff] %v6188_v50  ;;  %v4019_v27 = vadd.f32 %v4011_v61, %v3811_v44  ;;  %v4013_v62 = vmul.f32 %v4005_v17, %v6188_v50  ;;  %v3559_v54 = vpop.f32.mrb[31].mxu0  ;;  %v4531_v63 = vadd.f32 %v3557_v6, %v6010_v16  ;;  %v4006_v16 = vld [vmem:[%s6340_s3 + $0xa0] sm:$0xff] }
 0x3b5   : > { %v4971_v14 = vpop.eup %4970  ;;  %v3974_v56 = vmul.f32 %v4969_v51, %v6048_v45  ;;  %v4026_v58 = vsub.f32 0.0, %v4018_v38  ;;  %v4020_v7 = vadd.f32 %v4012_v26, %v3812_v57  ;;  %v4532_v28 = vadd.f32 %v3559_v54, %v6012_v18 }
 0x3b6   : > { %v4973_v37 = vpop.eup %4972  ;;  %v3975_v30 = vmul.f32 %v4971_v14, %v6051_v48  ;;  %v4027_v15 = vsub.f32 0.0, %v4019_v27  ;;  %v4021_v42 = vadd.f32 %v4013_v62, %v3813_v29  ;;  %v3816_v13 = vadd.f32 %v4531_v63, %v3784_v10 }
 0x3b7   : > { %v4975_v0 = vpop.eup %4974  ;;  %v6204_v9 = vadd.f32 %v6141_v8, %v3974_v56  ;;  %v3976_v24 = vmul.f32 %v4973_v37, %v6060_v55  ;;  %v4034_v46 = vmul.f32 1.442695, %v4026_v58  ;;  %v4028_v39 = vsub.f32 0.0, %v4020_v7  ;;  %v4007_v55 = vld [vmem:[%s6340_s3 + $0xa8] sm:$0xff] }
 0x3b8   : > { %v6211_v45 = vadd.f32 %v6143_v60, %v3975_v30  ;;  %v3977_v48 = vmul.f32 %v4975_v0, %v6066_v21  ;;  %v4036_v32 = vmul.f32 1.442695, %v4027_v15  ;;  %v4029_v2 = vsub.f32 0.0, %v4021_v42  ;;  %v3779_v21 = vpop.permute.xlu1 %3778 }
 0x3b9   : > { %4114 = vst [vmem:[%s6174_s15 + $0x20] sm:$0xff] %v6204_v9  ;;  %v6223_v8 = vadd.f32 %v6145_v23, %v3976_v24  ;;  %4976 = vpow2.f32 %v4034_v46  ;;  %v4038_v60 = vmul.f32 1.442695, %v4028_v39  ;;  %v3814_v41 = vadd.f32 %v4529_v59, %v3779_v21  ;;  %v4009_v23 = vld [vmem:[%s6340_s3 + $0xb8] sm:$0xff] }
 0x3ba   : > { %4115 = vst [vmem:[%s6174_s15 + $0x28] sm:$0xff] %v6211_v45  ;;  %v6231_v33 = vadd.f32 %v6147_v25, %v3977_v48  ;;  %4978 = vpow2.f32 %v4036_v32  ;;  %v4040_v34 = vmul.f32 1.442695, %v4029_v2  ;;  %v3815_v25 = vadd.f32 %v4530_v1, %v3779_v21 }
 0x3bb   : > { %4116 = vst [vmem:[%s6174_s15 + $0x30] sm:$0xff] %v6223_v8  ;;  %4980 = vpow2.f32 %v4038_v60  ;;  %v4014_v36 = vmul.f32 %v4006_v16, %v6204_v9  ;;  %v4015_v43 = vmul.f32 %v4007_v55, %v6211_v45  ;;  %v4016_v3 = vmul.f32 %v4008_v4, %v6223_v8 }
 0x3bc   : > { %4117 = vst [vmem:[%s6174_s15 + $0x38] sm:$0xff] %v6231_v33  ;;  %4982 = vpow2.f32 %v4040_v34  ;;  %v4017_v52 = vmul.f32 %v4009_v23, %v6231_v33  ;;  %s5012_s15 = sshll.u32 %s5113_s20, 4  ;;  %s5013_s15 = int_to_ptr.vmem [resolvable:$false] %s5012_s15 }
 0x3bd   : > { %v4022_v35 = vadd.f32 %v4014_v36, %v3814_v41  ;;  %v4023_v12 = vadd.f32 %v4015_v43, %v3815_v25  ;;  %s5014_s26 = scalar_lea.vmem %s5013_s15, 2048  ;;  %p5015_p3 = scmp.lt.s32.totalorder %s6208_s22, %s5013_s15 }
 0x3be   : > { %p5016_p4 = scmp.lt.s32.totalorder %s5014_s26, %s5008_s19 }
 0x3c0   : > { %p5017_p5 = por %p5016_p4, %p5015_p3 }
 0x3c2   : > { %p5018_p7 = pnand %p5017_p5, %p5011_p2 }
 0x3c4   : > { %5021 = shalt.err (!%p5018_p7)
}
 0x3c5   : > { %s5022_s10 = scalar_lea.hbm %s6239_s13, 1024  ;;  %s5026_s12 = scalar_lea.hbm %s6345_s8, 2048 }
 0x3c6   : > { %p5023_p10 = scmp.ne.s32.totalorder %s6239_s13, %s5022_s10  ;;  %p5027_p13 = scmp.lt.u32.totalorder %s6239_s13, %s6345_s8 }
 0x3c7   : > { %p5028_p0 = scmp.lt.u32.totalorder %s5026_s12, %s5022_s10  ;;  %p5030_p2 = scmp.lt.u32.totalorder %s5022_s10, %s6239_s13 }
 0x3c8   : > { %p5024_p11 = pnand %p5023_p10, %p5207_p6 }
 0x3c9   : > { %p5029_p1 = por %p5028_p0, %p5027_p13 }
 0x3ca   : > { %p5025_p12 = pneg %p5024_p11 }
 0x3cb   : > { %p5031_p3 = por %p5030_p2, %p5029_p1 }
 0x3cd   : > { %p5032_p4 = pnand %p5031_p3, %p5025_p12 }
 0x3cf   : > { %5035 = shalt.err (!%p5032_p4)
}
 0x3d0   : > { %s5114_s19 = smov 256   ;;  %s5115_s26 = smov 512   ;;  %v3817_v18 = vadd.f32 %v4532_v28, %v3784_v10  ;;  %v4030_v22 = vsub.f32 0.0, %v4022_v35  ;;  %v4031_v49 = vsub.f32 0.0, %v4023_v12  ;;  %v4024_v40 = vadd.f32 %v4016_v3, %v3816_v13  ;;  %v4977_v53 = vpop.eup %4976 }
 0x3d1   : > { %4758 = dma.vmem_to_hbm [thread:$0]  (%p5207_p6), %s6208_s22, 1024, %s6239_s13, %s4124_s18, %s5114_s19, %s5115_s26, %s5110_s21   ;;  %v4979_v31 = vpop.eup %4978  ;;  %v4050_v38 = vadd.f32 1.0, %v4977_v53  ;;  %v4066_v56 = vmax.f32 %v6159_v11, 0.0  ;;  %v4067_v37 = vmax.f32 %v6166_v19, 0.0  ;;  %v4068_v42 = vmax.f32 %v6179_v20, 0.0 }
 0x3d2   : > { %v4025_v5 = vadd.f32 %v4017_v52, %v3817_v18  ;;  %v4042_v17 = vmul.f32 1.442695, %v4030_v22  ;;  %v4044_v47 = vmul.f32 1.442695, %v4031_v49  ;;  %v4032_v44 = vsub.f32 0.0, %v4024_v40  ;;  %v4981_v26 = vpop.eup %4980  ;;  %s6356_s21 = sshll.u32 %s5246_s25, 5 }
 0x3d3   : > { %v4051_v57 = vadd.f32 1.0, %v4979_v31  ;;  %v4983_v1 = vpop.eup %4982  ;;  %v4052_v6 = vadd.f32 1.0, %v4981_v26  ;;  %v4069_v24 = vmax.f32 %v6188_v50, 0.0  ;;  %s424_s22 = scalar_lea.vmem [#allocation5], %s6356_s21  ;;  %v4070_v20 = vmax.f32 %v6204_v9, 0.0  ;;  %s4493_s13 = sshll.u32 %s5185_s9, 7 }
 0x3d4   : > { %v4033_v61 = vsub.f32 0.0, %v4025_v5  ;;  %4984 = vpow2.f32 %v4042_v17  ;;  %v4046_v59 = vmul.f32 1.442695, %v4032_v44  ;;  %v4053_v27 = vadd.f32 1.0, %v4983_v1  ;;  %s4137_s18 = sshll.u32 %s424_s22, 4  ;;  %s6290_s24 = scalar_lea.hbm %s6344_s7, %s4493_s13  ;;  %s6292_s18 = int_to_ptr.vmem [resolvable:$true] %s4137_s18 }
 0x3d5   : > { %4986 = vpow2.f32 %v4044_v47  ;;  %v4071_v50 = vmax.f32 %v6211_v45, 0.0  ;;  %v4072_v21 = vmax.f32 %v6223_v8, 0.0  ;;  %v4073_v36 = vmax.f32 %v6231_v33, 0.0  ;;  %s4119_s12 = scalar_lea.sflag [#allocation6], %s5246_s25  ;;  %s5036_s20 = scalar_lea.vmem %s6292_s18, 512 }
 0x3d6   : > { %4988 = vpow2.f32 %v4046_v59  ;;  %v4048_v51 = vmul.f32 1.442695, %v4033_v61  ;;  %p5037_p5 = scmp.ne.s32.totalorder %s6292_s18, %s5036_s20  ;;  %s5116_s9 = smov [#allocation5]  }
 0x3d7   : > { %4990 = vrcp.f32 %v4050_v38  ;;  %s5040_s15 = sshll.u32 %s5116_s9, 4  ;;  %s5041_s15 = int_to_ptr.vmem [resolvable:$false] %s5040_s15 }
 0x3d8   : > { %4992 = vrcp.f32 %v4051_v57  ;;  %p5038_p7 = pnand %p5037_p5, %p5207_p6  ;;  %s5042_s26 = scalar_lea.vmem %s5041_s15, 1024 }
 0x3d9   : > { %4994 = vrcp.f32 %v4052_v6  ;;  %p5043_p11 = scmp.lt.s32.totalorder %s6292_s18, %s5041_s15  ;;  %p5044_p12 = scmp.lt.s32.totalorder %s5042_s26, %s5036_s20 }
 0x3da   : > { %4996 = vrcp.f32 %v4053_v27  ;;  %p5039_p10 = pneg %p5038_p7 }
 0x3db   : > { %4998 = vpow2.f32 %v4048_v51  ;;  %p5045_p13 = por %p5044_p12, %p5043_p11 }
 0x3dd   : > { %p5046_p0 = pnand %p5045_p13, %p5039_p10 }
 0x3de   : > { %v4985_v62 = vpop.eup %4984 }
 0x3df   : > { %v4987_v29 = vpop.eup %4986  ;;  %v4054_v54 = vadd.f32 1.0, %v4985_v62 }
 0x3e0   : > { %v4989_v14 = vpop.eup %4988  ;;  %v4055_v58 = vadd.f32 1.0, %v4987_v29 }
 0x3e1   : > { %v4991_v7 = vpop.eup %4990  ;;  %5000 = vrcp.f32 %v4054_v54  ;;  %v4056_v30 = vadd.f32 1.0, %v4989_v14 }
 0x3e2   : > { %v4993_v15 = vpop.eup %4992  ;;  %v4074_v63 = vmul.f32 %v4991_v7, %v4066_v56  ;;  %5002 = vrcp.f32 %v4055_v58 }
 0x3e3   : > { %v4995_v0 = vpop.eup %4994  ;;  %v4075_v46 = vmul.f32 %v4993_v15, %v4067_v37  ;;  %5004 = vrcp.f32 %v4056_v30 }
 0x3e4   : > { %v4997_v39 = vpop.eup %4996  ;;  %v4076_v48 = vmul.f32 %v4995_v0, %v4068_v42 }
 0x3e5   : > { %v4999_v11 = vpop.eup %4998  ;;  %v4489_v32 = vpack.c.bf16 %v4075_v46, %v4074_v63  ;;  %v4077_v2 = vmul.f32 %v4997_v39, %v4069_v24 }
 0x3e6   : > { %v4057_v16 = vadd.f32 1.0, %v4999_v11 }
 0x3e7   : > { %4106 = vst [vmem:[%s424_s22] sm:$0xff] %v4489_v32  ;;  %v4490_v19 = vpack.c.bf16 %v4077_v2, %v4076_v48 }
 0x3e8   : > { %5006 = vrcp.f32 %v4057_v16 }
 0x3e9   : > { %4107 = vst [vmem:[%s424_s22 + $0x8] sm:$0xff] %v4490_v19 }
 0x3eb   : > { %v5001_v55 = vpop.eup %5000 }
 0x3ec   : > { %v5003_v60 = vpop.eup %5002  ;;  %v4078_v4 = vmul.f32 %v5001_v55, %v4070_v20 }
 0x3ed   : > { %v5005_v34 = vpop.eup %5004  ;;  %v4079_v41 = vmul.f32 %v5003_v60, %v4071_v50 }
 0x3ee   : > { %v4080_v23 = vmul.f32 %v5005_v34, %v4072_v21 }
 0x3ef   : > { %v4491_v25 = vpack.c.bf16 %v4079_v41, %v4078_v4 }
 0x3f1   : > { %4108 = vst [vmem:[%s424_s22 + $0x10] sm:$0xff] %v4491_v25 }
 0x3f2   : > { %v5007_v43 = vpop.eup %5006 }
 0x3f3   : > { %v4081_v9 = vmul.f32 %v5007_v43, %v4073_v36 }
 0x3f5   : > { %v4492_v45 = vpack.c.bf16 %v4081_v9, %v4080_v23 }
 0x3f7   : > { %4109 = vst [vmem:[%s424_s22 + $0x18] sm:$0xff] %v4492_v45 }
 0x3f8   : > { %5049 = shalt.err (!%p5046_p0)
}
 0x3f9   : > { %s5050_s21 = scalar_lea.hbm %s6290_s24, 512  ;;  %s5054_s10 = scalar_lea.hbm %s6344_s7, 1024 }
 0x3fa   : > { %p5051_p1 = scmp.ne.s32.totalorder %s6290_s24, %s5050_s21  ;;  %p5055_p4 = scmp.lt.u32.totalorder %s6290_s24, %s6344_s7 }
 0x3fb   : > { %p5056_p5 = scmp.lt.u32.totalorder %s5054_s10, %s5050_s21  ;;  %p5058_p10 = scmp.lt.u32.totalorder %s5050_s21, %s6290_s24 }
 0x3fc   : > { %p5052_p2 = pnand %p5051_p1, %p5207_p6 }
 0x3fd   : > { %p5057_p7 = por %p5056_p5, %p5055_p4 }
 0x3fe   : > { %p5053_p3 = pneg %p5052_p2 }
 0x3ff   : > { %p5059_p11 = por %p5058_p10, %p5057_p7 }
 0x401   : > { %p5060_p12 = pnand %p5059_p11, %p5053_p3 }
 0x403   : > { %5063 = shalt.err (!%p5060_p12)
}
 0x404   : > { %s5117_s20 = smov 128   ;;  %s5118_s15 = smov 8  }
 0x405   : > { %4757 = dma.vmem_to_hbm [thread:$0]  (%p5207_p6), %s6292_s18, 512, %s6290_s24, %s4119_s12, %s5117_s20, %s5114_s19, %s5118_s15  }
 0x406 PF: > { %s4168_s26 = sand.u32 1, %s5090_s27   ;;  %p4762_p13 = pnand %p4285_p9, %p5211_p8 }
 0x407   : > { %s4169_s21 = scalar_lea.sflag [#allocation6], %s4168_s26 }
 0x408   : > { %5081 = dma.done.wait (!%p4762_p13), %s4169_s21, 512  }
 0x409   : > { %5083 = vsyncadd (!%p4762_p13), %s4169_s21, 4294966784  ;;  %s4178_s22 = scalar_lea.sflag [#allocation8], %s4168_s26 }
 0x40a   : > { %5085 = dma.done.wait (!%p4762_p13), %s4178_s22, 1024  }
 0x40b   : > { %5087 = vsyncadd (!%p4762_p13), %s4178_s22, 4294966272  ;;  %p22_p6 = scmp.ge.s32.totalorder %s5189_s11, 4   ;;  %s6357_s27 = smov %s5094_s28 }
 0x40c   : > { %s6358_s28 = smov %s5098_s29  ;;  %s6359_s29 = smov %s5201_s14 }
 0x40d   : > { %s6360_s30 = smov %s5189_s11  ;;  %24 = sbr.rel (!%p22_p6) target bundleno = 5 (0x5), region = 177 }
 0x414   :  { %4183 = vsyncpa [#allocation6], 1 }
 0x415   :  { %4185 = vsyncpa [#allocation6 + $0x1], 1 }
 0x416   :  { %4186 = vsyncpa [#allocation8], 1 }
 0x417   :  { %4188 = vsyncpa [#allocation8 + $0x1], 1 }

</bundles_post_ra>
